<compile_context>
chip_gen: v7x
topology: tpu7x:2x2x1
jax: 0.10.0
libtpu: 0.0.40
codegen_flags: <defaults>
</compile_context>

<pallas_src>
import functools

import jax
import jax.numpy as jnp
from jax.experimental import pallas as pl
from jax.experimental.pallas import tpu as pltpu


def _round_up(n, m):
    return ((n + m - 1) // m) * m


def _choose_tb(BN, block_batch):
    """Largest divisor of BN <= block_batch, then halved if needed so the grid
    has >= 2 steps (v7x megacore)."""
    tb = max(1, min(block_batch, BN))
    while BN % tb:
        tb -= 1
    if BN >= 2 and BN // tb < 2:
        tb = max(1, BN // 2)
        while BN % tb:
            tb -= 1
    return tb


def _cond_res_block_kernel(x_ref, lat_ref, wfc_ref, bfc_ref, wconv_ref,
                           bconv_ref, pool_ref, o_ref, pad_ref, *, tb, L, K,
                           Lout):
    """One grid step: `tb` batch elements, full CondResBlock1d forward.

    x_ref    : [tb, Lp, Cp]        input, spatially pre-padded + channel-padded
    lat_ref  : [tb, 1, Ldp]        latent vectors (padded)
    wfc_ref  : [Ldp, 4*Cp]         fused latent FC weights (gain1|bias1|gain2|bias2)
    bfc_ref  : [1, 4*Cp]           fused latent FC biases
    wconv_ref: [3, K*Cp, Cp]       im2col conv weights [conv1 | conv2 | conv_down]
    bconv_ref: [3, 1, Cp]          conv biases
    pool_ref : [tb*Lout, tb*L]     block-diagonal avg-pool matrix (kron(I, pool))
    o_ref    : [tb, Lout, Cp]      output
    pad_ref  : [tb, Lp, Cp]        batched VMEM halo scratch
    """
    f32 = jnp.float32
    half = K // 2
    Cp = o_ref.shape[-1]
    cdt = wconv_ref.dtype  # bf16 (default) or f32 for exact checks

    # Re-zero only the halo rows (middle rows are always overwritten before
    # being read); keeps "parallel" scheduling safe on a fresh per-core scratch.
    pad_ref[:, :half, :] = jnp.zeros((tb, half, Cp), f32)
    pad_ref[:, half + L:2 * half + L, :] = jnp.zeros((tb, half, Cp), f32)

    # Load the whole x block once; reused for conv1 im2col and the residual.
    xv = x_ref[...]                                          # [tb, Lp, Cp] f32

    # ---- FiLM parameters: one fused [tb, Ldp] @ [Ldp, 4*Cp] matmul ----------
    lat = lat_ref[...][:, 0, :]                              # [tb, Ldp]
    fp = jnp.dot(lat, wfc_ref[...], preferred_element_type=f32) + bfc_ref[...]
    gain1 = fp[:, 0 * Cp:1 * Cp][:, None, :]                 # [tb, 1, Cp]
    bias1 = fp[:, 1 * Cp:2 * Cp][:, None, :]
    gain2 = fp[:, 2 * Cp:3 * Cp][:, None, :]
    bias2 = fp[:, 3 * Cp:4 * Cp][:, None, :]

    def swish(v):
        return v * jax.nn.sigmoid(v)

    def conv(v_pad, idx):
        # im2col: one MXU matmul per conv, contraction K*Cp (>= 256-deep on
        # v6e/v7x), batched over all tb elements at once.
        cols = jnp.concatenate([v_pad[:, k:k + L, :] for k in range(K)],
                               axis=-1)                      # [tb, L, K*Cp] f32
        y = jnp.dot(cols.reshape(tb * L, K * Cp).astype(cdt), wconv_ref[idx],
                    preferred_element_type=f32)              # [tb*L, Cp] f32
        return y.reshape(tb, L, Cp) + bconv_ref[idx]

    # conv1 -> FiLM1 -> swish
    h = swish(gain1 * conv(xv, 0) + bias1)                   # [tb, L, Cp]

    # conv2 -> FiLM2 -> swish  (halo via batched scratch, one round-trip)
    pad_ref[:, half:half + L, :] = h
    h = swish(gain2 * conv(pad_ref[...], 1) + bias2)

    # residual
    r = xv[:, half:half + L, :] + h

    # conv_downsample -> swish -> avg_pool (stride 2) as block-diagonal matmul
    pad_ref[:, half:half + L, :] = r
    d = swish(conv(pad_ref[...], 2))                         # [tb, L, Cp]
    out = jnp.dot(pool_ref[...], d.reshape(tb * L, Cp),
                  preferred_element_type=f32)                # [tb*Lout, Cp]
    o_ref[...] = out.reshape(tb, Lout, Cp).astype(o_ref.dtype)


def cond_res_block1d_pallas(x, latent, params, *, block_batch=16,
                            conv_dtype=jnp.bfloat16):
    """CondResBlock1d forward (downsample=True, rescale=False).

    x      : [BN, C, L]  float32  (BN = latent.shape[0] * latent.shape[1])
    latent : [B, N, Ld]  float32, or None (the module's no-FiLM branch)
    params : PyTorch-layout weights:
             conv1_w / conv2_w / convd_w [C, C, K], conv*_b [C],
             fc1_w / fc2_w [2C, Ld], fc*_b [2C]
    conv_dtype : MXU operand dtype for the convs (bf16 default, f32 for exact).
    returns: [BN, C, Lout] with Lout = (L + 2*(K//2) - K)//2 + 1

    All weight preparation below is input-invariant; run the whole function
    under one jax.jit so it is computed/cached once.
    """
    BN, C, L = x.shape
    K = params["conv1_w"].shape[-1]
    half = K // 2
    Lp = L + 2 * half
    Lout = (L + 2 * half - K) // 2 + 1
    Cp = _round_up(C, 128)
    f32 = jnp.float32

    tb = _choose_tb(BN, block_batch)
    grid = (BN // tb,)

    # --- activations: [BN, L, C] -> spatially pre-padded, lane-dense ---------
    xt = jnp.transpose(x, (0, 2, 1)).astype(f32)             # [BN, L, C]
    xt = jnp.pad(xt, ((0, 0), (half, half), (0, Cp - C)))    # [BN, Lp, Cp]

    # --- latent FiLM parameters (fused 4*Cp-wide FC) --------------------------
    if latent is not None:
        B, N, Ld = latent.shape
        assert B * N == BN, "x batch must equal latent batch*nodes"
        Ldp = _round_up(Ld, 128)
        lat = latent.reshape(BN, Ld).astype(f32)
        lat = jnp.pad(lat, ((0, 0), (0, Ldp - Ld)))[:, None, :]   # [BN, 1, Ldp]

        def split_fc(w, b):
            # PyTorch Linear: y = latent @ w.T + b ; gain = y[:C], bias = y[C:]
            wg = jnp.pad(w[:C, :].T, ((0, Ldp - Ld), (0, Cp - C)))
            wb = jnp.pad(w[C:, :].T, ((0, Ldp - Ld), (0, Cp - C)))
            bg = jnp.pad(b[:C], (0, Cp - C))[None, :]
            bb = jnp.pad(b[C:], (0, Cp - C))[None, :]
            return wg, wb, bg, bb

        wg1, wb1, bg1, bb1 = split_fc(params["fc1_w"].astype(f32),
                                      params["fc1_b"].astype(f32))
        wg2, wb2, bg2, bb2 = split_fc(params["fc2_w"].astype(f32),
                                      params["fc2_b"].astype(f32))
        wfc = jnp.concatenate([wg1, wb1, wg2, wb2], axis=1)   # [Ldp, 4*Cp]
        bfc = jnp.concatenate([bg1, bb1, bg2, bb2], axis=1)   # [1, 4*Cp]
    else:
        # latent is None => no FiLM, i.e. gain = 1, bias = 0 (on real lanes).
        Ldp = 128
        lat = jnp.zeros((BN, 1, Ldp), f32)
        one = jnp.pad(jnp.ones((C,), f32), (0, Cp - C))[None, :]
        zero = jnp.zeros((1, Cp), f32)
        wfc = jnp.zeros((Ldp, 4 * Cp), f32)
        bfc = jnp.concatenate([one, zero, one, zero], axis=1)  # [1, 4*Cp]

    # --- conv weights: im2col layout [K*Cp, Cp], channel-padded, bf16 --------
    def prep_conv(w):                                          # w: [Cout, Cin, K]
        wt = jnp.transpose(w.astype(f32), (2, 1, 0))           # [K, Cin, Cout]
        wt = jnp.pad(wt, ((0, 0), (0, Cp - C), (0, Cp - C)))   # [K, Cp, Cp]
        return wt.reshape(K * Cp, Cp)

    wconv = jnp.stack(
        [prep_conv(params["conv1_w"]), prep_conv(params["conv2_w"]),
         prep_conv(params["convd_w"])]).astype(conv_dtype)     # [3, K*Cp, Cp]
    bconv = jnp.stack(
        [jnp.pad(params["conv1_b"].astype(f32), (0, Cp - C))[None, :],
         jnp.pad(params["conv2_b"].astype(f32), (0, Cp - C))[None, :],
         jnp.pad(params["convd_b"].astype(f32), (0, Cp - C))[None, :]])  # [3,1,Cp]

    # --- avg_pool1d(k=K, stride=2, pad=half, count_include_pad) as a block-
    # --- diagonal matrix over the tb elements of one grid step ----------------
    rows = jnp.arange(Lout, dtype=jnp.int32)[:, None]
    cols = jnp.arange(L, dtype=jnp.int32)[None, :]
    pool = jnp.where(jnp.abs(cols - 2 * rows) <= half, 1.0 / K, 0.0).astype(f32)
    pool_big = jnp.kron(jnp.eye(tb, dtype=f32), pool)          # [tb*Lout, tb*L]

    kernel = functools.partial(_cond_res_block_kernel, tb=tb, L=L, K=K,
                               Lout=Lout)

    flops = (BN * (2 * 3 * L * K * Cp * Cp + 2 * Ldp * 4 * Cp)
             + 2 * BN * tb * Lout * L * Cp)
    bytes_accessed = (4 * int(xt.size + lat.size + wfc.size + bfc.size +
                              bconv.size + pool_big.size + BN * Lout * Cp)
                      + int(wconv.size) * wconv.dtype.itemsize)
    cost = pl.CostEstimate(flops=flops, transcendentals=BN * 3 * L * Cp,
                           bytes_accessed=bytes_accessed)

    # NOTE: weight BlockSpecs use constant index_maps so they stay VMEM
    # resident across the grid; at Cp=128 the double-buffered footprint is
    # < 2 MiB, no vmem_limit override needed (re-check if C scales to ~512).
    out = pl.pallas_call(
        kernel,
        out_shape=jax.ShapeDtypeStruct((BN, Lout, Cp), f32),
        grid=grid,
        in_specs=[
            pl.BlockSpec((tb, Lp, Cp), lambda i: (i, 0, 0)),       # x (per block)
            pl.BlockSpec((tb, 1, Ldp), lambda i: (i, 0, 0)),       # latent
            pl.BlockSpec((Ldp, 4 * Cp), lambda i: (0, 0)),         # FC weights
            pl.BlockSpec((1, 4 * Cp), lambda i: (0, 0)),           # FC biases
            pl.BlockSpec((3, K * Cp, Cp), lambda i: (0, 0, 0)),    # conv weights
            pl.BlockSpec((3, 1, Cp), lambda i: (0, 0, 0)),         # conv biases
            pl.BlockSpec((tb * Lout, tb * L), lambda i: (0, 0)),   # pool matrix
        ],
        out_specs=pl.BlockSpec((tb, Lout, Cp), lambda i: (i, 0, 0)),
        scratch_shapes=[pltpu.VMEM((tb, Lp, Cp), f32)],
        compiler_params=pltpu.CompilerParams(
            dimension_semantics=("parallel",)),
        cost_estimate=cost,
    )(xt, lat, wfc, bfc, wconv, bconv, pool_big)

    # drop channel padding, back to PyTorch layout [BN, C, Lout]
    return jnp.transpose(out[:, :, :C], (0, 2, 1))


def cond_res_block1d_ref(x, latent, params):
    """Pure-JAX reference mirroring the PyTorch forward()."""
    hp = jax.lax.Precision.HIGHEST
    BN, C, L = x.shape
    K = params["conv1_w"].shape[-1]
    half = K // 2
    dn = ("NCW", "OIW", "NCW")

    def conv(h, w, b):
        y = jax.lax.conv_general_dilated(h, w, window_strides=(1,),
                                         padding=[(half, half)],
                                         dimension_numbers=dn, precision=hp)
        return y + b[None, :, None]

    def swish(v):
        return v * jax.nn.sigmoid(v)

    if latent is not None:
        B, N, _ = latent.shape
        l1 = jnp.matmul(latent, params["fc1_w"].T, precision=hp) + params["fc1_b"]
        l2 = jnp.matmul(latent, params["fc2_w"].T, precision=hp) + params["fc2_b"]
        gain1, bias1 = l1[..., :C], l1[..., C:]
        gain2, bias2 = l2[..., :C], l2[..., C:]

        h = conv(x, params["conv1_w"], params["conv1_b"]).reshape(B, N, C, L)
        h = swish(gain1[..., None] * h + bias1[..., None]).reshape(BN, C, L)
        h = conv(h, params["conv2_w"], params["conv2_b"]).reshape(B, N, C, L)
        h = swish(gain2[..., None] * h + bias2[..., None]).reshape(BN, C, L)
    else:
        h = swish(conv(x, params["conv1_w"], params["conv1_b"]))
        h = swish(conv(h, params["conv2_w"], params["conv2_b"]))

    r = x + h
    d = swish(conv(r, params["convd_w"], params["convd_b"]))
    dp = jnp.pad(d, ((0, 0), (0, 0), (half, half)))
    s = jax.lax.reduce_window(dp, jnp.float32(0), jax.lax.add,
                              window_dimensions=(1, 1, K),
                              window_strides=(1, 1, 2), padding="VALID")
    return s / K


if __name__ == "__main__":
    key = jax.random.PRNGKey(0)
    B, N = 2, 4                  # latent batch x nodes -> conv batch BN = 8
    C, Ld, L, K = 64, 64, 16, 5  # filters, latent_dim, spatial length, kernel

    ks = jax.random.split(key, 12)

    def nrm(k, shape, scale):
        return (jax.random.normal(k, shape) * scale).astype(jnp.float32)

    params = {
        "conv1_w": nrm(ks[0], (C, C, K), (1.0 / (C * K)) ** 0.5),
        "conv1_b": nrm(ks[1], (C,), 0.1),
        "conv2_w": nrm(ks[2], (C, C, K), (1.0 / (C * K)) ** 0.5),
        "conv2_b": nrm(ks[3], (C,), 0.1),
        "convd_w": nrm(ks[4], (C, C, K), (1.0 / (C * K)) ** 0.5),
        "convd_b": nrm(ks[5], (C,), 0.1),
        "fc1_w": nrm(ks[6], (2 * C, Ld), (1.0 / Ld) ** 0.5),
        "fc1_b": nrm(ks[7], (2 * C,), 0.1),
        "fc2_w": nrm(ks[8], (2 * C, Ld), (1.0 / Ld) ** 0.5),
        "fc2_b": nrm(ks[9], (2 * C,), 0.1),
    }
    x = jax.random.normal(ks[10], (B * N, C, L), dtype=jnp.float32)
    latent = jax.random.normal(ks[11], (B, N, Ld), dtype=jnp.float32)

    Lout = (L - 1) // 2 + 1
    ref = cond_res_block1d_ref(x, latent, params)

    # Default fast path: bf16 MXU operands, f32 accumulation / VPU math.
    fwd_bf16 = jax.jit(lambda xv, lv: cond_res_block1d_pallas(xv, lv, params))
    out = jax.block_until_ready(fwd_bf16(x, latent))
    assert out.shape == (B * N, C, Lout)
    assert jnp.allclose(out, ref, atol=5e-2, rtol=5e-2), \
        float(jnp.max(jnp.abs(out - ref)))

    # Exact-semantics check with f32 MXU operands (tight tolerance).
    fwd_f32 = jax.jit(lambda xv, lv: cond_res_block1d_pallas(
        xv, lv, params, conv_dtype=jnp.float32))
    out32 = jax.block_until_ready(fwd_f32(x, latent))
    assert jnp.allclose(out32, ref, atol=2e-3, rtol=2e-3), \
        float(jnp.max(jnp.abs(out32 - ref)))

    # latent=None branch of the module (no FiLM), same weights.
    fwd_none = jax.jit(lambda xv: cond_res_block1d_pallas(
        xv, None, params, conv_dtype=jnp.float32))
    out_n = jax.block_until_ready(fwd_none(x))
    ref_n = cond_res_block1d_ref(x, None, params)
    assert jnp.allclose(out_n, ref_n, atol=2e-3, rtol=2e-3), \
        float(jnp.max(jnp.abs(out_n - ref_n)))

    print("KERNEL_OK")
</pallas_src>

<mosaic_0001>
module attributes {stable_mosaic.version = 11 : i64} {
  func.func @_cond_res_block_kernel(%arg0: i32, %arg1: memref<4x20x128xf32, #tpu.memory_space<vmem>>, %arg2: memref<4x1x128xf32, #tpu.memory_space<vmem>>, %arg3: memref<128x512xf32, #tpu.memory_space<vmem>>, %arg4: memref<1x512xf32, #tpu.memory_space<vmem>>, %arg5: memref<3x640x128xbf16, #tpu.memory_space<vmem>>, %arg6: memref<3x1x128xf32, #tpu.memory_space<vmem>>, %arg7: memref<32x64xf32, #tpu.memory_space<vmem>>, %arg8: memref<4x8x128xf32, #tpu.memory_space<vmem>>, %arg9: memref<4x20x128xf32, #tpu.memory_space<vmem>>) attributes {dimension_semantics = [#tpu.dimension_semantics<parallel>], iteration_bounds = array<i64: 2>, scalar_prefetch = 0 : i64, scratch_operands = 1 : i64, tpu.core_type = #tpu.core_type<tc>, window_params = [{transform_indices = @transform_0, window_bounds = array<i64: 4, 20, 128>}, {transform_indices = @transform_1, window_bounds = array<i64: 4, 1, 128>}, {pipeline_mode = #tpu.pipeline_mode<synchronous>, transform_indices = @transform_2, window_bounds = array<i64: 128, 512>}, {pipeline_mode = #tpu.pipeline_mode<synchronous>, transform_indices = @transform_3, window_bounds = array<i64: 1, 512>}, {pipeline_mode = #tpu.pipeline_mode<synchronous>, transform_indices = @transform_4, window_bounds = array<i64: 3, 640, 128>}, {pipeline_mode = #tpu.pipeline_mode<synchronous>, transform_indices = @transform_5, window_bounds = array<i64: 3, 1, 128>}, {pipeline_mode = #tpu.pipeline_mode<synchronous>, transform_indices = @transform_6, window_bounds = array<i64: 32, 64>}, {transform_indices = @transform_7, window_bounds = array<i64: 4, 8, 128>}]} {
    %cst = arith.constant 0.000000e+00 : f32
    %0 = vector.broadcast %cst : f32 to vector<4x2x128xf32>
    %c0 = arith.constant 0 : index
    %c0_0 = arith.constant 0 : index
    %c0_1 = arith.constant 0 : index
    %1 = vector.load %arg9[%c0, %c0_0, %c0_1] : memref<4x20x128xf32, #tpu.memory_space<vmem>>, vector<4x2x128xf32>
    tpu.vector_store %arg9[%c0, %c0_0, %c0_1], %0 {strides = array<i32>} : memref<4x20x128xf32, #tpu.memory_space<vmem>>, vector<4x2x128xf32>,
    %cst_2 = arith.constant 0.000000e+00 : f32
    %2 = vector.broadcast %cst_2 : f32 to vector<4x2x128xf32>
    %c0_3 = arith.constant 0 : index
    %c18 = arith.constant 18 : index
    %c0_4 = arith.constant 0 : index
    %3 = vector.load %arg9[%c0_3, %c18, %c0_4] : memref<4x20x128xf32, #tpu.memory_space<vmem>>, vector<4x2x128xf32>
    tpu.vector_store %arg9[%c0_3, %c18, %c0_4], %2 {strides = array<i32>} : memref<4x20x128xf32, #tpu.memory_space<vmem>>, vector<4x2x128xf32>,
    %c0_5 = arith.constant 0 : index
    %c0_6 = arith.constant 0 : index
    %c0_7 = arith.constant 0 : index
    %4 = vector.load %arg1[%c0_5, %c0_6, %c0_7] : memref<4x20x128xf32, #tpu.memory_space<vmem>>, vector<4x20x128xf32>
    %c0_8 = arith.constant 0 : index
    %c0_9 = arith.constant 0 : index
    %c0_10 = arith.constant 0 : index
    %5 = vector.load %arg2[%c0_8, %c0_9, %c0_10] : memref<4x1x128xf32, #tpu.memory_space<vmem>>, vector<4x1x128xf32>
    %6 = vector.shape_cast %5 : vector<4x1x128xf32> to vector<4x128xf32>
    %c0_11 = arith.constant 0 : index
    %c0_12 = arith.constant 0 : index
    %7 = vector.load %arg3[%c0_11, %c0_12] : memref<128x512xf32, #tpu.memory_space<vmem>>, vector<128x512xf32>
    %cst_13 = arith.constant dense<0.000000e+00> : vector<4x512xf32>
    %8 = tpu.matmul %6, %7, %cst_13 {dimension_numbers = #tpu.dot_dimension_numbers<[1], [0], [0], [1], [0, 0, 1, 1], [], []>} : vector<4x128xf32>, vector<128x512xf32>, vector<4x512xf32> -> vector<4x512xf32>
    %c0_14 = arith.constant 0 : index
    %c0_15 = arith.constant 0 : index
    %9 = vector.load %arg4[%c0_14, %c0_15] : memref<1x512xf32, #tpu.memory_space<vmem>>, vector<1x512xf32>
    %10 = vector.broadcast %9 : vector<1x512xf32> to vector<4x512xf32>
    %11 = arith.addf %8, %10 : vector<4x512xf32>
    %12 = vector.extract_strided_slice %11 {offsets = [0, 0], sizes = [4, 128], strides = [1, 1]} : vector<4x512xf32> to vector<4x128xf32>
    %13 = vector.shape_cast %12 : vector<4x128xf32> to vector<4x1x128xf32>
    %14 = vector.extract_strided_slice %11 {offsets = [0, 128], sizes = [4, 128], strides = [1, 1]} : vector<4x512xf32> to vector<4x128xf32>
    %15 = vector.shape_cast %14 : vector<4x128xf32> to vector<4x1x128xf32>
    %16 = vector.extract_strided_slice %11 {offsets = [0, 256], sizes = [4, 128], strides = [1, 1]} : vector<4x512xf32> to vector<4x128xf32>
    %17 = vector.shape_cast %16 : vector<4x128xf32> to vector<4x1x128xf32>
    %18 = vector.extract_strided_slice %11 {offsets = [0, 384], sizes = [4, 128], strides = [1, 1]} : vector<4x512xf32> to vector<4x128xf32>
    %19 = vector.shape_cast %18 : vector<4x128xf32> to vector<4x1x128xf32>
    %20 = vector.extract_strided_slice %4 {offsets = [0, 0, 0], sizes = [4, 16, 128], strides = [1, 1, 1]} : vector<4x20x128xf32> to vector<4x16x128xf32>
    %21 = vector.extract_strided_slice %4 {offsets = [0, 1, 0], sizes = [4, 16, 128], strides = [1, 1, 1]} : vector<4x20x128xf32> to vector<4x16x128xf32>
    %22 = vector.extract_strided_slice %4 {offsets = [0, 2, 0], sizes = [4, 16, 128], strides = [1, 1, 1]} : vector<4x20x128xf32> to vector<4x16x128xf32>
    %23 = vector.extract_strided_slice %4 {offsets = [0, 3, 0], sizes = [4, 16, 128], strides = [1, 1, 1]} : vector<4x20x128xf32> to vector<4x16x128xf32>
    %24 = vector.extract_strided_slice %4 {offsets = [0, 4, 0], sizes = [4, 16, 128], strides = [1, 1, 1]} : vector<4x20x128xf32> to vector<4x16x128xf32>
    %25 = tpu.concatenate %20, %21, %22, %23, %24 in 2 : vector<4x16x128xf32>, vector<4x16x128xf32>, vector<4x16x128xf32>, vector<4x16x128xf32>, vector<4x16x128xf32> -> vector<4x16x640xf32>
    %26 = vector.shape_cast %25 : vector<4x16x640xf32> to vector<64x640xf32>
    %27 = arith.truncf %26 : vector<64x640xf32> to vector<64x640xbf16>
    %c0_16 = arith.constant 0 : index
    %c0_17 = arith.constant 0 : index
    %c0_18 = arith.constant 0 : index
    %28 = vector.load %arg5[%c0_16, %c0_17, %c0_18] : memref<3x640x128xbf16, #tpu.memory_space<vmem>>, vector<1x640x128xbf16>
    %29 = vector.shape_cast %28 : vector<1x640x128xbf16> to vector<640x128xbf16>
    %cst_19 = arith.constant dense<0.000000e+00> : vector<64x128xf32>
    %30 = tpu.matmul %27, %29, %cst_19 {dimension_numbers = #tpu.dot_dimension_numbers<[1], [0], [0], [1], [0, 0, 1, 1], [], []>} : vector<64x640xbf16>, vector<640x128xbf16>, vector<64x128xf32> -> vector<64x128xf32>
    %31 = vector.shape_cast %30 : vector<64x128xf32> to vector<4x16x128xf32>
    %c0_20 = arith.constant 0 : index
    %c0_21 = arith.constant 0 : index
    %c0_22 = arith.constant 0 : index
    %32 = vector.load %arg6[%c0_20, %c0_21, %c0_22] : memref<3x1x128xf32, #tpu.memory_space<vmem>>, vector<1x1x128xf32>
    %33 = vector.shape_cast %32 : vector<1x1x128xf32> to vector<1x128xf32>
    %34 = vector.shape_cast %33 : vector<1x128xf32> to vector<1x1x128xf32>
    %35 = vector.broadcast %34 : vector<1x1x128xf32> to vector<4x16x128xf32>
    %36 = arith.addf %31, %35 : vector<4x16x128xf32>
    %37 = vector.broadcast %13 : vector<4x1x128xf32> to vector<4x16x128xf32>
    %38 = arith.mulf %37, %36 : vector<4x16x128xf32>
    %39 = vector.broadcast %15 : vector<4x1x128xf32> to vector<4x16x128xf32>
    %40 = arith.addf %38, %39 : vector<4x16x128xf32>
    %41 = arith.negf %40 : vector<4x16x128xf32>
    %42 = math.exp %41 : vector<4x16x128xf32>
    %cst_23 = arith.constant 1.000000e+00 : f32
    %43 = vector.broadcast %cst_23 : f32 to vector<4x16x128xf32>
    %44 = arith.addf %43, %42 : vector<4x16x128xf32>
    %45 = arith.divf %43, %44 : vector<4x16x128xf32>
    %46 = arith.mulf %40, %45 : vector<4x16x128xf32>
    %c0_24 = arith.constant 0 : index
    %c2 = arith.constant 2 : index
    %c0_25 = arith.constant 0 : index
    %47 = vector.load %arg9[%c0_24, %c2, %c0_25] : memref<4x20x128xf32, #tpu.memory_space<vmem>>, vector<4x16x128xf32>
    tpu.vector_store %arg9[%c0_24, %c2, %c0_25], %46 {strides = array<i32>} : memref<4x20x128xf32, #tpu.memory_space<vmem>>, vector<4x16x128xf32>,
    %c0_26 = arith.constant 0 : index
    %c0_27 = arith.constant 0 : index
    %c0_28 = arith.constant 0 : index
    %48 = vector.load %arg9[%c0_26, %c0_27, %c0_28] : memref<4x20x128xf32, #tpu.memory_space<vmem>>, vector<4x20x128xf32>
    %49 = vector.extract_strided_slice %48 {offsets = [0, 0, 0], sizes = [4, 16, 128], strides = [1, 1, 1]} : vector<4x20x128xf32> to vector<4x16x128xf32>
    %50 = vector.extract_strided_slice %48 {offsets = [0, 1, 0], sizes = [4, 16, 128], strides = [1, 1, 1]} : vector<4x20x128xf32> to vector<4x16x128xf32>
    %51 = vector.extract_strided_slice %48 {offsets = [0, 2, 0], sizes = [4, 16, 128], strides = [1, 1, 1]} : vector<4x20x128xf32> to vector<4x16x128xf32>
    %52 = vector.extract_strided_slice %48 {offsets = [0, 3, 0], sizes = [4, 16, 128], strides = [1, 1, 1]} : vector<4x20x128xf32> to vector<4x16x128xf32>
    %53 = vector.extract_strided_slice %48 {offsets = [0, 4, 0], sizes = [4, 16, 128], strides = [1, 1, 1]} : vector<4x20x128xf32> to vector<4x16x128xf32>
    %54 = tpu.concatenate %49, %50, %51, %52, %53 in 2 : vector<4x16x128xf32>, vector<4x16x128xf32>, vector<4x16x128xf32>, vector<4x16x128xf32>, vector<4x16x128xf32> -> vector<4x16x640xf32>
    %55 = vector.shape_cast %54 : vector<4x16x640xf32> to vector<64x640xf32>
    %56 = arith.truncf %55 : vector<64x640xf32> to vector<64x640xbf16>
    %c1 = arith.constant 1 : index
    %c0_29 = arith.constant 0 : index
    %c0_30 = arith.constant 0 : index
    %57 = vector.load %arg5[%c1, %c0_29, %c0_30] : memref<3x640x128xbf16, #tpu.memory_space<vmem>>, vector<1x640x128xbf16>
    %58 = vector.shape_cast %57 : vector<1x640x128xbf16> to vector<640x128xbf16>
    %cst_31 = arith.constant dense<0.000000e+00> : vector<64x128xf32>
    %59 = tpu.matmul %56, %58, %cst_31 {dimension_numbers = #tpu.dot_dimension_numbers<[1], [0], [0], [1], [0, 0, 1, 1], [], []>} : vector<64x640xbf16>, vector<640x128xbf16>, vector<64x128xf32> -> vector<64x128xf32>
    %60 = vector.shape_cast %59 : vector<64x128xf32> to vector<4x16x128xf32>
    %c1_32 = arith.constant 1 : index
    %c0_33 = arith.constant 0 : index
    %c0_34 = arith.constant 0 : index
    %61 = vector.load %arg6[%c1_32, %c0_33, %c0_34] : memref<3x1x128xf32, #tpu.memory_space<vmem>>, vector<1x1x128xf32>
    %62 = vector.shape_cast %61 : vector<1x1x128xf32> to vector<1x128xf32>
    %63 = vector.shape_cast %62 : vector<1x128xf32> to vector<1x1x128xf32>
    %64 = vector.broadcast %63 : vector<1x1x128xf32> to vector<4x16x128xf32>
    %65 = arith.addf %60, %64 : vector<4x16x128xf32>
    %66 = vector.broadcast %17 : vector<4x1x128xf32> to vector<4x16x128xf32>
    %67 = arith.mulf %66, %65 : vector<4x16x128xf32>
    %68 = vector.broadcast %19 : vector<4x1x128xf32> to vector<4x16x128xf32>
    %69 = arith.addf %67, %68 : vector<4x16x128xf32>
    %70 = arith.negf %69 : vector<4x16x128xf32>
    %71 = math.exp %70 : vector<4x16x128xf32>
    %cst_35 = arith.constant 1.000000e+00 : f32
    %72 = vector.broadcast %cst_35 : f32 to vector<4x16x128xf32>
    %73 = arith.addf %72, %71 : vector<4x16x128xf32>
    %74 = arith.divf %72, %73 : vector<4x16x128xf32>
    %75 = arith.mulf %69, %74 : vector<4x16x128xf32>
    %76 = vector.extract_strided_slice %4 {offsets = [0, 2, 0], sizes = [4, 16, 128], strides = [1, 1, 1]} : vector<4x20x128xf32> to vector<4x16x128xf32>
    %77 = arith.addf %76, %75 : vector<4x16x128xf32>
    %c0_36 = arith.constant 0 : index
    %c2_37 = arith.constant 2 : index
    %c0_38 = arith.constant 0 : index
    %78 = vector.load %arg9[%c0_36, %c2_37, %c0_38] : memref<4x20x128xf32, #tpu.memory_space<vmem>>, vector<4x16x128xf32>
    tpu.vector_store %arg9[%c0_36, %c2_37, %c0_38], %77 {strides = array<i32>} : memref<4x20x128xf32, #tpu.memory_space<vmem>>, vector<4x16x128xf32>,
    %c0_39 = arith.constant 0 : index
    %c0_40 = arith.constant 0 : index
    %c0_41 = arith.constant 0 : index
    %79 = vector.load %arg9[%c0_39, %c0_40, %c0_41] : memref<4x20x128xf32, #tpu.memory_space<vmem>>, vector<4x20x128xf32>
    %80 = vector.extract_strided_slice %79 {offsets = [0, 0, 0], sizes = [4, 16, 128], strides = [1, 1, 1]} : vector<4x20x128xf32> to vector<4x16x128xf32>
    %81 = vector.extract_strided_slice %79 {offsets = [0, 1, 0], sizes = [4, 16, 128], strides = [1, 1, 1]} : vector<4x20x128xf32> to vector<4x16x128xf32>
    %82 = vector.extract_strided_slice %79 {offsets = [0, 2, 0], sizes = [4, 16, 128], strides = [1, 1, 1]} : vector<4x20x128xf32> to vector<4x16x128xf32>
    %83 = vector.extract_strided_slice %79 {offsets = [0, 3, 0], sizes = [4, 16, 128], strides = [1, 1, 1]} : vector<4x20x128xf32> to vector<4x16x128xf32>
    %84 = vector.extract_strided_slice %79 {offsets = [0, 4, 0], sizes = [4, 16, 128], strides = [1, 1, 1]} : vector<4x20x128xf32> to vector<4x16x128xf32>
    %85 = tpu.concatenate %80, %81, %82, %83, %84 in 2 : vector<4x16x128xf32>, vector<4x16x128xf32>, vector<4x16x128xf32>, vector<4x16x128xf32>, vector<4x16x128xf32> -> vector<4x16x640xf32>
    %86 = vector.shape_cast %85 : vector<4x16x640xf32> to vector<64x640xf32>
    %87 = arith.truncf %86 : vector<64x640xf32> to vector<64x640xbf16>
    %c2_42 = arith.constant 2 : index
    %c0_43 = arith.constant 0 : index
    %c0_44 = arith.constant 0 : index
    %88 = vector.load %arg5[%c2_42, %c0_43, %c0_44] : memref<3x640x128xbf16, #tpu.memory_space<vmem>>, vector<1x640x128xbf16>
    %89 = vector.shape_cast %88 : vector<1x640x128xbf16> to vector<640x128xbf16>
    %cst_45 = arith.constant dense<0.000000e+00> : vector<64x128xf32>
    %90 = tpu.matmul %87, %89, %cst_45 {dimension_numbers = #tpu.dot_dimension_numbers<[1], [0], [0], [1], [0, 0, 1, 1], [], []>} : vector<64x640xbf16>, vector<640x128xbf16>, vector<64x128xf32> -> vector<64x128xf32>
    %91 = vector.shape_cast %90 : vector<64x128xf32> to vector<4x16x128xf32>
    %c2_46 = arith.constant 2 : index
    %c0_47 = arith.constant 0 : index
    %c0_48 = arith.constant 0 : index
    %92 = vector.load %arg6[%c2_46, %c0_47, %c0_48] : memref<3x1x128xf32, #tpu.memory_space<vmem>>, vector<1x1x128xf32>
    %93 = vector.shape_cast %92 : vector<1x1x128xf32> to vector<1x128xf32>
    %94 = vector.shape_cast %93 : vector<1x128xf32> to vector<1x1x128xf32>
    %95 = vector.broadcast %94 : vector<1x1x128xf32> to vector<4x16x128xf32>
    %96 = arith.addf %91, %95 : vector<4x16x128xf32>
    %97 = arith.negf %96 : vector<4x16x128xf32>
    %98 = math.exp %97 : vector<4x16x128xf32>
    %cst_49 = arith.constant 1.000000e+00 : f32
    %99 = vector.broadcast %cst_49 : f32 to vector<4x16x128xf32>
    %100 = arith.addf %99, %98 : vector<4x16x128xf32>
    %101 = arith.divf %99, %100 : vector<4x16x128xf32>
    %102 = arith.mulf %96, %101 : vector<4x16x128xf32>
    %c0_50 = arith.constant 0 : index
    %c0_51 = arith.constant 0 : index
    %103 = vector.load %arg7[%c0_50, %c0_51] : memref<32x64xf32, #tpu.memory_space<vmem>>, vector<32x64xf32>
    %104 = vector.shape_cast %102 : vector<4x16x128xf32> to vector<64x128xf32>
    %cst_52 = arith.constant dense<0.000000e+00> : vector<32x128xf32>
    %105 = tpu.matmul %103, %104, %cst_52 {dimension_numbers = #tpu.dot_dimension_numbers<[1], [0], [0], [1], [0, 0, 1, 1], [], []>} : vector<32x64xf32>, vector<64x128xf32>, vector<32x128xf32> -> vector<32x128xf32>
    %106 = vector.shape_cast %105 : vector<32x128xf32> to vector<4x8x128xf32>
    %c0_53 = arith.constant 0 : index
    %c0_54 = arith.constant 0 : index
    %c0_55 = arith.constant 0 : index
    %107 = vector.load %arg8[%c0_53, %c0_54, %c0_55] : memref<4x8x128xf32, #tpu.memory_space<vmem>>, vector<4x8x128xf32>
    tpu.vector_store %arg8[%c0_53, %c0_54, %c0_55], %106 {strides = array<i32>} : memref<4x8x128xf32, #tpu.memory_space<vmem>>, vector<4x8x128xf32>,
    return
  }
  func.func @transform_0(%arg0: i32) -> (i32, i32, i32) {
    %c0_i32 = arith.constant 0 : i32
    %c0_i32_0 = arith.constant 0 : i32
    %c0_i32_1 = arith.constant 0 : i32
    return %arg0, %c0_i32, %c0_i32_0 : i32, i32, i32
  }
  func.func @transform_1(%arg0: i32) -> (i32, i32, i32) {
    %c0_i32 = arith.constant 0 : i32
    %c0_i32_0 = arith.constant 0 : i32
    %c0_i32_1 = arith.constant 0 : i32
    return %arg0, %c0_i32, %c0_i32_0 : i32, i32, i32
  }
  func.func @transform_2(%arg0: i32) -> (i32, i32) {
    %c0_i32 = arith.constant 0 : i32
    %c0_i32_0 = arith.constant 0 : i32
    %c0_i32_1 = arith.constant 0 : i32
    return %c0_i32, %c0_i32_0 : i32, i32
  }
  func.func @transform_3(%arg0: i32) -> (i32, i32) {
    %c0_i32 = arith.constant 0 : i32
    %c0_i32_0 = arith.constant 0 : i32
    %c0_i32_1 = arith.constant 0 : i32
    return %c0_i32, %c0_i32_0 : i32, i32
  }
  func.func @transform_4(%arg0: i32) -> (i32, i32, i32) {
    %c0_i32 = arith.constant 0 : i32
    %c0_i32_0 = arith.constant 0 : i32
    %c0_i32_1 = arith.constant 0 : i32
    %c0_i32_2 = arith.constant 0 : i32
    return %c0_i32, %c0_i32_0, %c0_i32_1 : i32, i32, i32
  }
  func.func @transform_5(%arg0: i32) -> (i32, i32, i32) {
    %c0_i32 = arith.constant 0 : i32
    %c0_i32_0 = arith.constant 0 : i32
    %c0_i32_1 = arith.constant 0 : i32
    %c0_i32_2 = arith.constant 0 : i32
    return %c0_i32, %c0_i32_0, %c0_i32_1 : i32, i32, i32
  }
  func.func @transform_6(%arg0: i32) -> (i32, i32) {
    %c0_i32 = arith.constant 0 : i32
    %c0_i32_0 = arith.constant 0 : i32
    %c0_i32_1 = arith.constant 0 : i32
    return %c0_i32, %c0_i32_0 : i32, i32
  }
  func.func @transform_7(%arg0: i32) -> (i32, i32, i32) {
    %c0_i32 = arith.constant 0 : i32
    %c0_i32_0 = arith.constant 0 : i32
    %c0_i32_1 = arith.constant 0 : i32
    return %arg0, %c0_i32, %c0_i32_0 : i32, i32, i32
  }
}

</mosaic_0001>

<bundles_post_ra>
// kernel: _lambda_.1
= control target key start
LH: loop header
LB: loop body
LE: loop exit
PB: predicated region body
PF: predicated region fallthrough
CT: control target
= control target key end

     0   :  { %12 = vsyncpa [#allocation4], 0  ;;  %s4249_s24 = smov 0   ;;  %s5033_s0 = inlined_call_operand.vmem [shape: f32[8,20,128], index: 0, kind: input, shape index: {}]   ;;  %s5034_s1 = inlined_call_operand.vmem [shape: f32[8,1,128], index: 1, kind: input, shape index: {}]   ;;  %s5035_s2 = inlined_call_operand.vmem [shape: f32[128,512], index: 2, kind: input, shape index: {}]   ;;  %s5036_s3 = inlined_call_operand.vmem [shape: f32[1,512], index: 3, kind: input, shape index: {}]   ;;  %s5037_s4 = inlined_call_operand.hbm [shape: bf16[3,640,128], index: 4, kind: input, shape index: {}]   ;;  %s5038_s5 = inlined_call_operand.vmem [shape: f32[3,1,128], index: 5, kind: input, shape index: {}]   ;;  %s5039_s6 = inlined_call_operand.vmem [shape: f32[32,64], index: 6, kind: input, shape index: {}]   ;;  %s5040_s7 = inlined_call_operand.vmem [shape: f32[8,8,128], index: 7, kind: output, shape index: {}]  }
   0x1 LB: > { %s3283_s25 = sadd.s32 4294967295, %s4202_s24   ;;  %p3285_p0 = scmp.ge.s32.totalorder %s4202_s24, 1  ;;  %s4202_s24 = sphi %s4249_s24, %s18_s24  }
   0x2   : > { %p206_p1 = scmp.lt.s32.totalorder %s4202_s24, 3  ;;  %s4204_s26 = smov [#allocation3]  }
   0x3   : > { %s224_s27 = sshll.u32 %s4204_s26, 4  ;;  %p4263_p3 = scmp.eq.s32.totalorder %s3283_s25, 0  ;;  %s225_s27 = int_to_ptr.vmem [resolvable:$true] %s224_s27 }
   0x4   : > { %p4257_p2 = pnand %p3285_p0, %p206_p1  ;;  %s4164_s10 = scalar_lea.hbm %s5037_s4, 15360 }
   0x5   : > { %s5045_s29 = scalar_select %p4263_p3, 1, 0 }
   0x6   : > { %s5044_s28 = scalar_select %p4257_p2, 1, 0 }
   0x7   : > { %p3917_p4 = pneg %p4257_p2  ;;  %p4165_p6 = scmp.ne.s32.totalorder %s5037_s4, %s4164_s10 }
   0x8   : > { %p4171_p10 = scmp.lt.u32.totalorder %s4164_s10, %s5037_s4 }
   0x9   : > { %p4271_p5 = pnand %p4263_p3, %p3917_p4 }
   0xb   : > { %p4166_p7 = pneg %p4271_p5 }
   0xd   : > { %p4167_p8 = pnand %p4166_p7, %p4165_p6 }
   0xf   : > { %p4168_p9 = pneg %p4167_p8 }
  0x11   : > { %p4173_p11 = pnand %p4171_p10, %p4168_p9 }
  0x13   : > { %4176 = shalt.err (!%p4173_p11)
}
  0x14   : > { %s4177_s15 = scalar_lea.vmem %s225_s27, 15360  ;;  %p4185_p1 = scmp.lt.s32.totalorder %s225_s27, %s225_s27 }
  0x15   : > { %p4178_p12 = scmp.ne.s32.totalorder %s225_s27, %s4177_s15  ;;  %p4186_p4 = scmp.lt.s32.totalorder %s4177_s15, %s4177_s15 }
  0x17   : > { %p4180_p13 = pnand %p4178_p12, %p4166_p7  ;;  %p4187_p3 = por %p4186_p4, %p4185_p1 }
  0x19   : > { %p4181_p0 = pneg %p4180_p13 }
  0x1b   : > { %p4188_p2 = pnand %p4187_p3, %p4181_p0 }
  0x1d   : > { %4191 = shalt.err (!%p4188_p2)
}
  0x1e   : > { %s4205_s16 = smov 64   ;;  %s4206_s17 = smov 4  }
  0x1f   : > { %3920 = dma.hbm_to_vmem [thread:$0]  (!%p4271_p5), %s5037_s4, 15360, %s225_s27, [#allocation4], %s4205_s16, %s4205_s16, %s4206_s17  }
  0x20   : > { %p5047_p6 = scmp.ne.s32.totalorder %s5044_s28, 0 }
  0x21   : > { %p5048_p8 = scmp.ne.s32.totalorder (!%p5047_p6), %s5045_s29, 0 }
  0x22   : > { %264 = sbr.rel (%p5047_p6) target bundleno = 1227 (0x4cb), region = 48 }
  0x29   : > { %4197 = dma.done.wait (%p5048_p8), [#allocation4], 15360  }
  0x2a   : > { %4199 = vsyncadd (%p5048_p8), [#allocation4], 4294951936  ;;  %v4207_v0 = vmov 0.0   ;;  %v345_v1 = vld [vmem:[%s5035_s2 + $0x8] sm:$0xff]  ;;  %v347_v3 = vld [vmem:[%s5035_s2 + $0x18] sm:$0xff]  ;;  %s4371_s28 = sshll.u32 %s3283_s25, 2  ;;  %v410_v52 = vlaneseq }
  0x2b   : > { %320 = vst [vmem:[#allocation2] sm:$0x3] %v4207_v0  ;;  %321 = vst [vmem:[#allocation2 + $0x18] sm:$0x3] %v4207_v0  ;;  %523 = vmatprep.mubr.f32.mxu0 %v4207_v0  ;;  %594 = vmatprep.mubr.f32.mxu1 %v4207_v0  ;;  %v349_v2 = vld [vmem:[%s5035_s2 + $0x28] sm:$0xff]  ;;  %v351_v5 = vld [vmem:[%s5035_s2 + $0x38] sm:$0xff] }
  0x2c   : > { %322 = vst [vmem:[#allocation2 + $0x30] sm:$0x3] %v4207_v0  ;;  %323 = vst [vmem:[#allocation2 + $0x48] sm:$0x3] %v4207_v0  ;;  %v3832_v4 = vpack.c.bf16 %v349_v2, %v345_v1  ;;  %v344_v6 = vld [vmem:[%s5035_s2] sm:$0xff]  ;;  %v3864_v8 = vpack.c.bf16 %v351_v5, %v347_v3  ;;  %v346_v10 = vld [vmem:[%s5035_s2 + $0x10] sm:$0xff] }
  0x2d   : > { %324 = vst [vmem:[#allocation2 + $0x12] sm:$0x3] %v4207_v0  ;;  %325 = vst [vmem:[#allocation2 + $0x2a] sm:$0x3] %v4207_v0  ;;  %v348_v7 = vld [vmem:[%s5035_s2 + $0x20] sm:$0xff]  ;;  %v350_v11 = vld [vmem:[%s5035_s2 + $0x30] sm:$0xff] }
  0x2e   : > { %326 = vst [vmem:[#allocation2 + $0x42] sm:$0x3] %v4207_v0  ;;  %327 = vst [vmem:[#allocation2 + $0x5a] sm:$0x3] %v4207_v0  ;;  %v3834_v9 = vpack.c.bf16 %v348_v7, %v344_v6  ;;  %v353_v12 = vld [vmem:[%s5035_s2 + $0x48] sm:$0xff]  ;;  %3833 = vmatprep.subr.bf16.mxu0 %v3832_v4  ;;  %v3866_v13 = vpack.c.bf16 %v350_v11, %v346_v10  ;;  %v355_v15 = vld [vmem:[%s5035_s2 + $0x58] sm:$0xff]  ;;  %3865 = vmatprep.subr.bf16.mxu1 %v3864_v8 }
  0x2f   : > { %v357_v14 = vld [vmem:[%s5035_s2 + $0x68] sm:$0xff]  ;;  %v359_v16 = vld [vmem:[%s5035_s2 + $0x78] sm:$0xff]  ;;  %v352_v19 = vld [vmem:[%s5035_s2 + $0x40] sm:$0xff]  ;;  %p302_p2 = scmp.lt.s32.totalorder %s4371_s28, 7  ;;  %v4208_v53 = vmov 1966171168  }
  0x30   : > { %3835 = vmatpush1.bf16.msra.mxu0 %v3834_v9  ;;  %v3836_v17 = vpack.c.bf16 %v357_v14, %v353_v12  ;;  %v3868_v18 = vpack.c.bf16 %v359_v16, %v355_v15  ;;  %v356_v20 = vld [vmem:[%s5035_s2 + $0x60] sm:$0xff]  ;;  %v354_v21 = vld [vmem:[%s5035_s2 + $0x50] sm:$0xff]  ;;  %3867 = vmatpush1.bf16.msra.mxu1 %v3866_v13  ;;  %v361_v24 = vld [vmem:[%s5035_s2 + $0x88] sm:$0xff]  ;;  %v437_v54 = vunpack.c.l.s4 %v4208_v53  ;;  %v4442_v4 = vshrl.u32 %v410_v52, 7 }
  0x31   : > { %v3838_v22 = vpack.c.bf16 %v356_v20, %v352_v19  ;;  %v358_v23 = vld [vmem:[%s5035_s2 + $0x70] sm:$0xff]  ;;  %v365_v25 = vld [vmem:[%s5035_s2 + $0xa8] sm:$0xff]  ;;  %v363_v28 = vld [vmem:[%s5035_s2 + $0x98] sm:$0xff]  ;;  %s5050_s28 = smov (!%p302_p2, %s4371_s28), 7  ;;  %vm713_vm0 = vcmask 1046528   ;;  %vm771_vm1 = vcmask 1044480  }
  0x32   : > { %3837 = vmatprep.subr.bf16.mxu0 %v3836_v17  ;;  %3869 = vmatprep.subr.bf16.mxu1 %v3868_v18  ;;  %v3870_v26 = vpack.c.bf16 %v358_v23, %v354_v21  ;;  %v3840_v27 = vpack.c.bf16 %v365_v25, %v361_v24  ;;  %v367_v29 = vld [vmem:[%s5035_s2 + $0xb8] sm:$0xff]  ;;  %v360_v30 = vld [vmem:[%s5035_s2 + $0x80] sm:$0xff]  ;;  %v362_v33 = vld [vmem:[%s5035_s2 + $0x90] sm:$0xff]  ;;  %v438_v5 = vunpack.c.0.s8 %v437_v54  ;;  %s311_s19 = scalar_lea.vmem %s5034_s1, %s5050_s28  ;;  %s3912_s27 = smul.u32 24, %s5050_s28  ;;  %vm742_vm2 = vcmask 1045504  }
  0x33   : > { %v3872_v31 = vpack.c.bf16 %v367_v29, %v363_v28  ;;  %v364_v32 = vld [vmem:[%s5035_s2 + $0xa0] sm:$0xff]  ;;  %v366_v34 = vld [vmem:[%s5035_s2 + $0xb0] sm:$0xff]  ;;  %v369_v36 = vld [vmem:[%s5035_s2 + $0xc8] sm:$0xff]  ;;  %vm800_vm3 = vcmask 1043456   ;;  %vm2307_vm4 = vcmask 1041408   ;;  %vm3104_vm5 = vcmask 523264  }
  0x34   : > { %3839 = vmatpush1.bf16.msra.mxu0 %v3838_v22  ;;  %v3842_v35 = vpack.c.bf16 %v364_v32, %v360_v30  ;;  %v373_v37 = vld [vmem:[%s5035_s2 + $0xe8] sm:$0xff]  ;;  %v371_v38 = vld [vmem:[%s5035_s2 + $0xd8] sm:$0xff]  ;;  %3871 = vmatpush1.bf16.msra.mxu1 %v3870_v26  ;;  %v3874_v39 = vpack.c.bf16 %v366_v34, %v362_v33  ;;  %v368_v42 = vld [vmem:[%s5035_s2 + $0xc0] sm:$0xff]  ;;  %v4488_v23 = vsub.s32 %v438_v5, %v4442_v4  ;;  %s4515_s8 = scalar_lea.vmem %s5033_s0, %s3912_s27  ;;  %s3294_s26 = sshll.u32 %s5050_s28, 3 }
  0x35   : > { %3841 = vmatprep.subr.bf16.mxu0 %v3840_v27  ;;  %v3844_v40 = vpack.c.bf16 %v373_v37, %v369_v36  ;;  %v375_v41 = vld [vmem:[%s5035_s2 + $0xf8] sm:$0xff]  ;;  %v372_v43 = vld [vmem:[%s5035_s2 + $0xe0] sm:$0xff]  ;;  %3873 = vmatprep.subr.bf16.mxu1 %v3872_v31  ;;  %v370_v45 = vld [vmem:[%s5035_s2 + $0xd0] sm:$0xff]  ;;  %s317_s30 = scalar_lea.vmem %s5040_s7, %s3294_s26 }
  0x36   : > { %v3876_v44 = vpack.c.bf16 %v375_v41, %v371_v38  ;;  %v374_v46 = vld [vmem:[%s5035_s2 + $0xf0] sm:$0xff]  ;;  %v377_v47 = vld [vmem:[%s5035_s2 + $0x108] sm:$0xff]  ;;  %v379_v49 = vld [vmem:[%s5035_s2 + $0x118] sm:$0xff]  ;;  %v3846_v51 = vpack.c.bf16 %v372_v43, %v368_v42 }
  0x37   : > { %v381_v48 = vld [vmem:[%s5035_s2 + $0x128] sm:$0xff]  ;;  %v383_v50 = vld [vmem:[%s5035_s2 + $0x138] sm:$0xff]  ;;  %v3878_v55 = vpack.c.bf16 %v374_v46, %v370_v45  ;;  %v376_v57 = vld [vmem:[%s5035_s2 + $0x100] sm:$0xff] }
  0x38   : > { %3843 = vmatpush1.bf16.msra.mxu0 %v3842_v35  ;;  %3875 = vmatpush1.bf16.msra.mxu1 %v3874_v39  ;;  %v3848_v56 = vpack.c.bf16 %v381_v48, %v377_v47  ;;  %v380_v58 = vld [vmem:[%s5035_s2 + $0x120] sm:$0xff]  ;;  %v378_v59 = vld [vmem:[%s5035_s2 + $0x110] sm:$0xff]  ;;  %v3880_v60 = vpack.c.bf16 %v383_v50, %v379_v49  ;;  %v385_v62 = vld [vmem:[%s5035_s2 + $0x148] sm:$0xff] }
  0x39   : > { %3845 = vmatprep.subr.bf16.mxu0 %v3844_v40  ;;  %3877 = vmatprep.subr.bf16.mxu1 %v3876_v44  ;;  %v382_v61 = vld [vmem:[%s5035_s2 + $0x130] sm:$0xff]  ;;  %v389_v63 = vld [vmem:[%s5035_s2 + $0x168] sm:$0xff]  ;;  %v387_v0 = vld [vmem:[%s5035_s2 + $0x158] sm:$0xff]  ;;  %v3850_v2 = vpack.c.bf16 %v380_v58, %v376_v57 }
  0x3a   : > { %v391_v1 = vld [vmem:[%s5035_s2 + $0x178] sm:$0xff]  ;;  %v384_v3 = vld [vmem:[%s5035_s2 + $0x140] sm:$0xff]  ;;  %v3882_v6 = vpack.c.bf16 %v382_v61, %v378_v59  ;;  %v3852_v7 = vpack.c.bf16 %v389_v63, %v385_v62  ;;  %v386_v9 = vld [vmem:[%s5035_s2 + $0x150] sm:$0xff] }
  0x3b   : > { %v388_v8 = vld [vmem:[%s5035_s2 + $0x160] sm:$0xff]  ;;  %v390_v10 = vld [vmem:[%s5035_s2 + $0x170] sm:$0xff]  ;;  %v3884_v11 = vpack.c.bf16 %v391_v1, %v387_v0  ;;  %v393_v12 = vld [vmem:[%s5035_s2 + $0x188] sm:$0xff] }
  0x3c   : > { %3847 = vmatpush1.bf16.msra.mxu0 %v3846_v51  ;;  %3879 = vmatpush1.bf16.msra.mxu1 %v3878_v55  ;;  %v397_v13 = vld [vmem:[%s5035_s2 + $0x1a8] sm:$0xff]  ;;  %v395_v14 = vld [vmem:[%s5035_s2 + $0x198] sm:$0xff]  ;;  %v392_v16 = vld [vmem:[%s5035_s2 + $0x180] sm:$0xff]  ;;  %v3854_v18 = vpack.c.bf16 %v388_v8, %v384_v3  ;;  %v3886_v24 = vpack.c.bf16 %v390_v10, %v386_v9 }
  0x3d   : > { %3849 = vmatprep.subr.bf16.mxu0 %v3848_v56  ;;  %3881 = vmatprep.subr.bf16.mxu1 %v3880_v60  ;;  %v399_v15 = vld [vmem:[%s5035_s2 + $0x1b8] sm:$0xff]  ;;  %v396_v17 = vld [vmem:[%s5035_s2 + $0x1a0] sm:$0xff]  ;;  %v394_v19 = vld [vmem:[%s5035_s2 + $0x190] sm:$0xff]  ;;  %v3856_v25 = vpack.c.bf16 %v397_v13, %v393_v12 }
  0x3e   : > { %v398_v20 = vld [vmem:[%s5035_s2 + $0x1b0] sm:$0xff]  ;;  %v401_v21 = vld [vmem:[%s5035_s2 + $0x1c8] sm:$0xff]  ;;  %v403_v26 = vld [vmem:[%s5035_s2 + $0x1d8] sm:$0xff]  ;;  %v3888_v30 = vpack.c.bf16 %v399_v15, %v395_v14  ;;  %v3858_v36 = vpack.c.bf16 %v396_v17, %v392_v16 }
  0x3f   : > { %v405_v22 = vld [vmem:[%s5035_s2 + $0x1e8] sm:$0xff]  ;;  %v407_v27 = vld [vmem:[%s5035_s2 + $0x1f8] sm:$0xff]  ;;  %v340_v28 = vld [vmem:[%s311_s19] sm:$0x1]  ;;  %v3890_v39 = vpack.c.bf16 %v398_v20, %v394_v19 }
  0x40   : > { %3851 = vmatpush1.bf16.msra.mxu0 %v3850_v2  ;;  %3883 = vmatpush1.bf16.msra.mxu1 %v3882_v6  ;;  %v341_v29 = vld [vmem:[%s311_s19 + $0x1] sm:$0x1]  ;;  %v342_v31 = vld [vmem:[%s311_s19 + $0x2] sm:$0x1]  ;;  %v343_v32 = vld [vmem:[%s311_s19 + $0x3] sm:$0x1]  ;;  %v3860_v40 = vpack.c.bf16 %v405_v22, %v401_v21  ;;  %v3892_v43 = vpack.c.bf16 %v407_v27, %v403_v26 }
  0x41   : > { %3853 = vmatprep.subr.bf16.mxu0 %v3852_v7  ;;  %3885 = vmatprep.subr.bf16.mxu1 %v3884_v11  ;;  %v434_v33 = vcombine.low %v340_v28, %v341_v29  ;;  %v400_v34 = vld [vmem:[%s5035_s2 + $0x1c0] sm:$0xff]  ;;  %v435_v35 = vcombine.low %v342_v31, %v343_v32  ;;  %v402_v41 = vld [vmem:[%s5035_s2 + $0x1d0] sm:$0xff]  ;;  %v3940_v53 = vld [vmem:[#allocation3 + $0x48] sm:$0xff]  }
  0x42   : > { %v404_v37 = vld [vmem:[%s5035_s2 + $0x1e0] sm:$0xff]  ;;  %v406_v44 = vld [vmem:[%s5035_s2 + $0x1f0] sm:$0xff]  ;;  %v3941_v54 = vld [vmem:[#allocation3 + $0xc8] sm:$0xff]  }
  0x43   : > { %v442_v38 = vrot.slane %v434_v33, %v4488_v23  ;;  %v449_v42 = vrot.slane %v435_v35, %v4488_v23  ;;  %v3862_v46 = vpack.c.bf16 %v404_v37, %v400_v34  ;;  %v3936_v47 = vld [vmem:[#allocation3 + $0x40] sm:$0xff]   ;;  %v3894_v48 = vpack.c.bf16 %v406_v44, %v402_v41  ;;  %v3942_v55 = vld [vmem:[#allocation3 + $0x8] sm:$0xff]   ;;  %v3944_v57 = vld [vmem:[#allocation3 + $0x50] sm:$0xff]  }
  0x44   : > { %3855 = vmatpush1.bf16.msra.mxu0 %v3854_v18  ;;  %3887 = vmatpush1.bf16.msra.mxu1 %v3886_v24  ;;  %v3937_v49 = vld [vmem:[#allocation3 + $0xc0] sm:$0xff]   ;;  %v3943_v56 = vld [vmem:[#allocation3 + $0x88] sm:$0xff]   ;;  %v3945_v58 = vld [vmem:[#allocation3 + $0xd0] sm:$0xff]  }
  0x45   : > { %3857 = vmatprep.subr.bf16.mxu0 %v3856_v25  ;;  %3889 = vmatprep.subr.bf16.mxu1 %v3888_v30  ;;  %v450_v45 = vcombine.low %v442_v38, %v449_v42  ;;  %v3938_v50 = vld [vmem:[#allocation3] sm:$0xff]   ;;  %v3946_v59 = vld [vmem:[#allocation3 + $0x10] sm:$0xff]   ;;  %v3948_v61 = vld [vmem:[#allocation3 + $0x58] sm:$0xff]  }
  0x46   : > { %v3939_v52 = vld [vmem:[#allocation3 + $0x80] sm:$0xff]   ;;  %v3947_v60 = vld [vmem:[#allocation3 + $0x90] sm:$0xff]   ;;  %v3949_v62 = vld [vmem:[#allocation3 + $0xd8] sm:$0xff]  }
  0x47   : > { %v457_v51 = vrot.slane %v450_v45, %v4488_v23  ;;  %v3950_v63 = vld [vmem:[#allocation3 + $0x18] sm:$0xff]   ;;  %v3952_v1 = vld [vmem:[#allocation3 + $0x60] sm:$0xff]   ;;  %v3956_v6 = vld [vmem:[#allocation3 + $0x68] sm:$0xff]  }
  0x48   : > { %3859 = vmatpush1.bf16.msra.mxu0 %v3858_v36  ;;  %3891 = vmatpush1.bf16.msra.mxu1 %v3890_v39  ;;  %v3951_v0 = vld [vmem:[#allocation3 + $0x98] sm:$0xff]   ;;  %v3953_v2 = vld [vmem:[#allocation3 + $0xe0] sm:$0xff]   ;;  %v3957_v7 = vld [vmem:[#allocation3 + $0xe8] sm:$0xff]  }
  0x49   : > { %3861 = vmatprep.subr.bf16.mxu0 %v3860_v40  ;;  %3893 = vmatprep.subr.bf16.mxu1 %v3892_v43  ;;  %v3954_v3 = vld [vmem:[#allocation3 + $0x20] sm:$0xff]   ;;  %v3958_v8 = vld [vmem:[#allocation3 + $0x28] sm:$0xff]   ;;  %v3960_v10 = vld [vmem:[#allocation3 + $0x70] sm:$0xff]  }
  0x4a   : > { %v3955_v5 = vld [vmem:[#allocation3 + $0xa0] sm:$0xff]   ;;  %v3959_v9 = vld [vmem:[#allocation3 + $0xa8] sm:$0xff]   ;;  %v3961_v11 = vld [vmem:[#allocation3 + $0xf0] sm:$0xff]  }
  0x4b   : > { %v3962_v12 = vld [vmem:[#allocation3 + $0x30] sm:$0xff]   ;;  %v4518_v13 = vld [vmem:[%s4515_s8] sm:$0xff]  ;;  %v4521_v15 = vld [vmem:[%s4515_s8 + $0x8] sm:$0xff] }
  0x4c   : > { %3863 = vmatpush1.bf16.msra.mxu0 %v3862_v46  ;;  %3895 = vmatpush1.bf16.msra.mxu1 %v3894_v48  ;;  %v3963_v14 = vld [vmem:[#allocation3 + $0xb0] sm:$0xff]   ;;  %v714_v17 = vrot.slane %v4518_v13, 1  ;;  %v772_v18 = vrot.slane %v4518_v13, 3  ;;  %v743_v19 = vrot.slane %v4518_v13, 2  ;;  %v715_v20 = vrot.slane %v4521_v15, 1  ;;  %v3964_v25 = vld [vmem:[#allocation3 + $0x78] sm:$0xff]  }
  0x4d   : > { %3450 = vmatprep.subr.bf16.mxu0 %v3936_v47  ;;  %3490 = vmatprep.subr.bf16.mxu1 %v3937_v49  ;;  %v4524_v16 = vld [vmem:[%s4515_s8 + $0x10] sm:$0xf]  ;;  %v773_v22 = vrot.slane %v4521_v15, 3  ;;  %v3965_v26 = vld [vmem:[#allocation3 + $0xf8] sm:$0xff]   ;;  %v744_v27 = vrot.slane %v4521_v15, 2  ;;  %v4543_v37 = vld [vmem:[%s4515_s8 + $0x20] sm:$0xff]  ;;  %v829_v49 = vpack.c.bf16 %v4521_v15, %v4518_v13 }
  0x4e   : > { %v717_v21 = vrot.slane %v4524_v16, 1  ;;  %v775_v24 = vrot.slane %v4524_v16, 3  ;;  %v746_v28 = vrot.slane %v4524_v16, 2  ;;  %v3966_v29 = vld [vmem:[#allocation3 + $0x38] sm:$0xff]   ;;  %v716_v30 = vsel %vm713_vm0, %v714_v17, %v715_v20  ;;  %v4546_v38 = vld [vmem:[%s4515_s8 + $0x28] sm:$0xf] }
  0x4f   : > { %524 = vmatmul.mubr.f32.vlgmr.msra.gmra.mrb[0].mxu0 %v457_v51  ;;  %595 = vmatmul.mubr.f32.vlgmr.msra.gmra.mrb[0].mxu1 %v457_v51  ;;  %v774_v32 = vsel %vm771_vm1, %v772_v18, %v773_v22  ;;  %v4540_v34 = vld [vmem:[%s4515_s8 + $0x18] sm:$0xff]  ;;  %v745_v40 = vsel %vm742_vm2, %v743_v19, %v744_v27  ;;  %v720_v42 = vrot.slane %v4543_v37, 1  ;;  %v722_v43 = vrot.slane %v4546_v38, 1  ;;  %v3968_v45 = vld [vmem:[#allocation3 + $0x100] sm:$0xff]   ;;  %v4590_v18 = vld [vmem:[%s4515_s8 + $0x50] sm:$0xff] }
  0x50   : > { %3451 = vmatpush3.bf16.msra.mxu0 %v3938_v50  ;;  %3491 = vmatpush3.bf16.msra.mxu1 %v3939_v52  ;;  %v718_v31 = vsel %vm713_vm0, %v715_v20, %v717_v21  ;;  %v776_v33 = vsel %vm771_vm1, %v773_v22, %v775_v24  ;;  %v3967_v39 = vld [vmem:[#allocation3 + $0xb8] sm:$0xff]   ;;  %v719_v41 = vrot.slane %v4540_v34, 1  ;;  %v747_v44 = vsel %vm742_vm2, %v744_v27, %v746_v28 }
  0x51   : > { %3452 = vmatprep.subr.bf16.mxu0 %v3940_v53  ;;  %3492 = vmatprep.subr.bf16.mxu1 %v3941_v54  ;;  %v830_v35 = vpack.c.bf16 %v718_v31, %v716_v30  ;;  %v832_v36 = vpack.c.bf16 %v776_v33, %v774_v32  ;;  %v777_v46 = vrot.slane %v4540_v34, 3  ;;  %v778_v47 = vrot.slane %v4543_v37, 3  ;;  %v4562_v53 = vld [vmem:[%s4515_s8 + $0x30] sm:$0xff]  ;;  %v4565_v54 = vld [vmem:[%s4515_s8 + $0x38] sm:$0xff] }
  0x52   : > { %v780_v48 = vrot.slane %v4546_v38, 3  ;;  %v721_v50 = vsel %vm713_vm0, %v719_v41, %v720_v42  ;;  %v723_v51 = vsel %vm713_vm0, %v720_v42, %v722_v43  ;;  %v748_v52 = vrot.slane %v4540_v34, 2  ;;  %v4593_v19 = vld [vmem:[%s4515_s8 + $0x58] sm:$0xf]  ;;  %v3972_v43 = vld [vmem:[#allocation3 + $0x120] sm:$0xff]  }
  0x53   : > { %1201 = vmatprep.mubr.bf16.mxu0 %v830_v35  ;;  %1266 = vmatprep.mubr.bf16.mxu1 %v832_v36  ;;  %v753_v20 = vrot.slane %v4562_v53, 2  ;;  %v754_v21 = vrot.slane %v4565_v54, 2  ;;  %v3971_v27 = vld [vmem:[#allocation3 + $0x118] sm:$0xff]   ;;  %v730_v30 = vrot.slane %v4590_v18, 1  ;;  %v732_v31 = vrot.slane %v4593_v19, 1 }
  0x54   : > { %3453 = vmatpush3.bf16.msra.mxu0 %v3942_v55  ;;  %3493 = vmatpush3.bf16.msra.mxu1 %v3943_v56  ;;  %v779_v55 = vsel %vm771_vm1, %v777_v46, %v778_v47  ;;  %v781_v56 = vsel %vm771_vm1, %v778_v47, %v780_v48  ;;  %v788_v33 = vrot.slane %v4590_v18, 3  ;;  %v790_v35 = vrot.slane %v4593_v19, 3 }
  0x55   : > { %3454 = vmatprep.subr.bf16.mxu0 %v3944_v57  ;;  %3494 = vmatprep.subr.bf16.mxu1 %v3945_v58  ;;  %v749_v57 = vrot.slane %v4543_v37, 2  ;;  %v751_v58 = vrot.slane %v4546_v38, 2  ;;  %v801_v41 = vrot.slane %v4518_v13, 4  ;;  %v802_v42 = vrot.slane %v4521_v15, 4 }
  0x56   : > { %v839_v46 = vpack.c.bf16 %v4565_v54, %v4562_v53  ;;  %v807_v47 = vrot.slane %v4543_v37, 4  ;;  %v809_v48 = vrot.slane %v4546_v38, 4  ;;  %v755_v13 = vsel %vm742_vm2, %v753_v20, %v754_v21  ;;  %v3973_v38 = vld [vmem:[#allocation3 + $0x128] sm:$0xff]   ;;  %v3979_v20 = vld [vmem:[#allocation3 + $0x1c0] sm:$0xff]  }
  0x58   : > { %3455 = vmatpush3.bf16.msra.mxu0 %v3946_v59  ;;  %3495 = vmatpush3.bf16.msra.mxu1 %v3947_v60  ;;  %v4572_v59 = vld [vmem:[%s4515_s8 + $0x40] sm:$0xf]  ;;  %v831_v60 = vpack.c.bf16 %v747_v44, %v745_v40  ;;  %v761_v40 = vrot.slane %v4593_v19, 2  ;;  %v804_v44 = vrot.slane %v4524_v16, 4  ;;  %v812_v16 = vrot.slane %v4565_v54, 4 }
  0x59   : > { %3456 = vmatprep.subr.bf16.mxu0 %v3948_v61  ;;  %3496 = vmatprep.subr.bf16.mxu1 %v3949_v62  ;;  %v724_v61 = vrot.slane %v4562_v53, 1  ;;  %v725_v62 = vrot.slane %v4565_v54, 1  ;;  %v756_v22 = vrot.slane %v4572_v59, 2 }
  0x5b   : > { %v757_v15 = vsel %vm742_vm2, %v754_v21, %v756_v22  ;;  %v3980_v21 = vld [vmem:[#allocation3 + $0x188] sm:$0xff]  }
  0x5c   : > { %3457 = vmatpush3.bf16.msra.mxu0 %v3950_v63  ;;  %3497 = vmatpush3.bf16.msra.mxu1 %v3951_v0  ;;  %v3969_v63 = vld [vmem:[#allocation3 + $0x108] sm:$0xff]   ;;  %v835_v0 = vpack.c.bf16 %v723_v51, %v721_v50  ;;  %v733_v50 = vsel %vm713_vm0, %v730_v30, %v732_v31  ;;  %v814_v51 = vrot.slane %v4572_v59, 4  ;;  %v3989_v31 = vld [vmem:[#allocation3 + $0x218] sm:$0xff]  }
  0x5d   : > { %3458 = vmatprep.subr.bf16.mxu0 %v3952_v1  ;;  %3498 = vmatprep.subr.bf16.mxu1 %v3953_v2  ;;  %v727_v1 = vrot.slane %v4572_v59, 1  ;;  %v782_v2 = vrot.slane %v4562_v53, 3  ;;  %v3981_v22 = vld [vmem:[#allocation3 + $0x208] sm:$0xff]  }
  0x60   : > { %3459 = vmatpush3.bf16.msra.mxu0 %v3954_v3  ;;  %3499 = vmatpush3.bf16.msra.mxu1 %v3955_v5  ;;  %v783_v3 = vrot.slane %v4565_v54, 3  ;;  %v837_v5 = vpack.c.bf16 %v781_v56, %v779_v55  ;;  %v791_v55 = vsel %vm771_vm1, %v788_v33, %v790_v35  ;;  %v817_v56 = vrot.slane %v4590_v18, 4  ;;  %v3992_v35 = vld [vmem:[#allocation3 + $0x1a0] sm:$0xff]  }
  0x61   : > { %3460 = vmatprep.subr.bf16.mxu0 %v3956_v6  ;;  %3500 = vmatprep.subr.bf16.mxu1 %v3957_v7  ;;  %v785_v6 = vrot.slane %v4572_v59, 3  ;;  %v4581_v7 = vld [vmem:[%s4515_s8 + $0x48] sm:$0xff]  ;;  %v841_v54 = vpack.c.bf16 %v757_v15, %v755_v13  ;;  %v4004_v13 = vld [vmem:[#allocation3 + $0x1b8] sm:$0xff]  }
  0x62   : > { %v729_v24 = vrot.slane %v4581_v7, 1  ;;  %v787_v32 = vrot.slane %v4581_v7, 3  ;;  %v758_v36 = vrot.slane %v4581_v7, 2  ;;  %v4005_v15 = vld [vmem:[#allocation3 + $0x238] sm:$0xff]  }
  0x63   : > { %v786_v17 = vsel %vm771_vm1, %v783_v3, %v785_v6  ;;  %v810_v6 = vsel %vm800_vm3, %v807_v47, %v809_v48  ;;  %v4003_v48 = vld [vmem:[#allocation3 + $0x1f0] sm:$0xff]  }
  0x64   : > { %3461 = vmatpush3.bf16.msra.mxu0 %v3958_v8  ;;  %3501 = vmatpush3.bf16.msra.mxu1 %v3959_v9  ;;  %v750_v8 = vsel %vm742_vm2, %v748_v52, %v749_v57  ;;  %v752_v9 = vsel %vm742_vm2, %v749_v57, %v751_v58  ;;  %v789_v52 = vsel %vm771_vm1, %v787_v32, %v788_v33  ;;  %v3990_v32 = vld [vmem:[#allocation3 + $0x158] sm:$0xff]  }
  0x65   : > { %3462 = vmatprep.subr.bf16.mxu0 %v3960_v10  ;;  %3502 = vmatprep.subr.bf16.mxu1 %v3961_v11  ;;  %v3970_v10 = vld [vmem:[#allocation3 + $0x110] sm:$0xff]   ;;  %v726_v11 = vsel %vm713_vm0, %v724_v61, %v725_v62  ;;  %v847_v58 = vpack.c.bf16 %v791_v55, %v789_v52  ;;  %v3991_v33 = vld [vmem:[#allocation3 + $0x1d8] sm:$0xff]  }
  0x68   : > { %3463 = vmatpush3.bf16.msra.mxu0 %v3962_v12  ;;  %3503 = vmatpush3.bf16.msra.mxu1 %v3963_v14  ;;  %v728_v12 = vsel %vm713_vm0, %v725_v62, %v727_v1  ;;  %v784_v14 = vsel %vm771_vm1, %v782_v2, %v783_v3  ;;  %v803_v62 = vsel %vm800_vm3, %v801_v41, %v802_v42  ;;  %v3975_v1 = vld [vmem:[#allocation3 + $0x138] sm:$0xff]   ;;  %v3996_v41 = vld [vmem:[#allocation3 + $0x1a8] sm:$0xff]  }
  0x69   : > { %3464 = vmatprep.subr.bf16.mxu0 %v3964_v25  ;;  %3504 = vmatprep.subr.bf16.mxu1 %v3965_v26  ;;  %v834_v25 = vpack.c.bf16 %v4543_v37, %v4540_v34  ;;  %v836_v26 = vpack.c.bf16 %v752_v9, %v750_v8  ;;  %v840_v28 = vpack.c.bf16 %v728_v12, %v726_v11  ;;  %v816_v37 = vrot.slane %v4581_v7, 4 }
  0x6a   : > { %v815_v9 = vsel %vm800_vm3, %v812_v16, %v814_v51  ;;  %v424_v51 = vsub.s32 3, %v4442_v4 }
  0x6b   : > { %v818_v11 = vsel %vm800_vm3, %v816_v37, %v817_v56  ;;  %v408_v37 = vld [vmem:[%s5036_s3] sm:$0xf] }
  0x6c   : > { %3465 = vmatpush3.bf16.msra.mxu0 %v3966_v29  ;;  %3505 = vmatpush3.bf16.msra.mxu1 %v3967_v39  ;;  %v842_v29 = vpack.c.bf16 %v786_v17, %v784_v14  ;;  %v759_v39 = vrot.slane %v4590_v18, 2  ;;  %v3976_v17 = vld [vmem:[#allocation3 + $0x180] sm:$0xff]   ;;  %v425_v52 = vrot.slane %v408_v37, %v424_v51 }
  0x6d   : > { %3738 = vmatprep.subr.bf16.mxu0 %v3968_v45  ;;  %3542 = vmatprep.subr.bf16.mxu1 %v3976_v17 }
  0x6e   : > { %v760_v59 = vsel %vm742_vm2, %v758_v36, %v759_v39  ;;  %v762_v61 = vsel %vm742_vm2, %v759_v39, %v761_v40  ;;  %v3993_v36 = vld [vmem:[#allocation3 + $0x220] sm:$0xff]  }
  0x6f   : > { %1202 = vmatmul.mubr.bf16.vlgmr.msra.gmra.mrb[4].mxu0 %v829_v49  ;;  %1267 = vmatmul.mubr.bf16.vlgmr.msra.gmra.mrb[4].mxu1 %v831_v60  ;;  %v811_v49 = vrot.slane %v4562_v53, 4  ;;  %v819_v53 = vrot.slane %v4593_v19, 4  ;;  %v3974_v60 = vld [vmem:[#allocation3 + $0x130] sm:$0xff]   ;;  %v846_v2 = vpack.c.bf16 %v762_v61, %v760_v59  ;;  %v3978_v19 = vld [vmem:[#allocation3 + $0x140] sm:$0xff]  }
  0x70   : > { %3739 = vmatpush3.bf16.msra.mxu0 %v3968_v45  ;;  %1209 = vmatprep.mubr.bf16.mxu0 %v835_v0  ;;  %v806_v45 = vrot.slane %v4540_v34, 4  ;;  %v731_v34 = vsel %vm713_vm0, %v729_v24, %v730_v30  ;;  %v844_v0 = vpack.c.bf16 %v4590_v18, %v4581_v7  ;;  %v3977_v18 = vld [vmem:[#allocation3 + $0x200] sm:$0xff]   ;;  %v3982_v24 = vld [vmem:[#allocation3 + $0x148] sm:$0xff]   ;;  %v3988_v30 = vld [vmem:[#allocation3 + $0x198] sm:$0xff]  }
  0x71   : > { %3740 = vmatprep.subr.bf16.mxu0 %v3969_v63  ;;  %1274 = vmatprep.mubr.bf16.mxu1 %v837_v5  ;;  %v845_v57 = vpack.c.bf16 %v733_v50, %v731_v34  ;;  %v813_v8 = vsel %vm800_vm3, %v811_v49, %v812_v16  ;;  %v820_v12 = vsel %vm800_vm3, %v817_v56, %v819_v53  ;;  %v3994_v39 = vld [vmem:[#allocation3 + $0x160] sm:$0xff]   ;;  %v4006_v49 = vld [vmem:[#allocation3 + $0x178] sm:$0xff]   ;;  %v420_v50 = vsub.s32 2, %v4442_v4 }
  0x72   : > { %v808_v5 = vsel %vm800_vm3, %v806_v45, %v807_v47  ;;  %v843_v7 = vpack.c.bf16 %v815_v9, %v813_v8  ;;  %v848_v14 = vpack.c.bf16 %v820_v12, %v818_v11  ;;  %3543 = vmatpush3.bf16.msra.mxu1 %v3978_v19  ;;  %v3995_v40 = vld [vmem:[#allocation3 + $0x1e0] sm:$0xff]   ;;  %v4000_v45 = vld [vmem:[#allocation3 + $0x1b0] sm:$0xff]   ;;  %v4007_v16 = vld [vmem:[#allocation3 + $0x1f8] sm:$0xff]   ;;  %v4656_v19 = vsub.s32 0, %v4442_v4 }
  0x73   : > { %3544 = vmatprep.subr.bf16.mxu1 %v3980_v21  ;;  %v4002_v47 = vld [vmem:[#allocation3 + $0x170] sm:$0xff]   ;;  %v4641_v34 = vld [vmem:[#allocation3 + $0x240] sm:$0xff]  }
  0x74   : > { %3741 = vmatpush3.bf16.msra.mxu0 %v3969_v63  ;;  %v805_v63 = vsel %vm800_vm3, %v802_v42, %v804_v44  ;;  %v3997_v42 = vld [vmem:[#allocation3 + $0x228] sm:$0xff]  }
  0x75   : > { %3742 = vmatprep.subr.bf16.mxu0 %v3970_v10  ;;  %v833_v3 = vpack.c.bf16 %v805_v63, %v803_v62  ;;  %v3999_v44 = vld [vmem:[#allocation3 + $0x1e8] sm:$0xff]  }
  0x76   : > { %3545 = vmatpush3.bf16.msra.mxu1 %v3982_v24 }
  0x77   : > { %1210 = vmatmul.mubr.bf16.gmra.mrb[8].mxu0 %v834_v25  ;;  %1275 = vmatmul.mubr.bf16.gmra.mrb[8].mxu1 %v836_v26  ;;  %v3983_v25 = vld [vmem:[#allocation3 + $0x1c8] sm:$0xff]   ;;  %v3984_v26 = vld [vmem:[#allocation3 + $0x190] sm:$0xff]  }
  0x78   : > { %3743 = vmatpush3.bf16.msra.mxu0 %v3970_v10  ;;  %1217 = vmatprep.mubr.bf16.mxu0 %v840_v28  ;;  %v838_v10 = vpack.c.bf16 %v810_v6, %v808_v5  ;;  %v3986_v28 = vld [vmem:[#allocation3 + $0x150] sm:$0xff]  }
  0x79   : > { %3744 = vmatprep.subr.bf16.mxu0 %v3971_v27  ;;  %1282 = vmatprep.mubr.bf16.mxu1 %v842_v29  ;;  %v3987_v29 = vld [vmem:[#allocation3 + $0x1d0] sm:$0xff]  }
  0x7a   : > { %3546 = vmatprep.subr.bf16.mxu1 %v3984_v26  ;;  %v416_v26 = vsub.s32 1, %v4442_v4 }
  0x7b   : > { %3547 = vmatpush3.bf16.msra.mxu1 %v3986_v28 }
  0x7c   : > { %3745 = vmatpush3.bf16.msra.mxu0 %v3971_v27  ;;  %v3985_v27 = vld [vmem:[#allocation3 + $0x210] sm:$0xff]   ;;  %3548 = vmatprep.subr.bf16.mxu1 %v3988_v30 }
  0x7d   : > { %3746 = vmatprep.subr.bf16.mxu0 %v3972_v43 }
  0x7f   : > { %1218 = vmatmul.mubr.bf16.gmra.mrb[12].mxu0 %v839_v46  ;;  %1283 = vmatmul.mubr.bf16.gmra.mrb[12].mxu1 %v841_v54  ;;  %v4001_v46 = vld [vmem:[#allocation3 + $0x230] sm:$0xff]  }
  0x80   : > { %3747 = vmatpush3.bf16.msra.mxu0 %v3972_v43  ;;  %1225 = vmatprep.mubr.bf16.mxu0 %v845_v57  ;;  %v3998_v43 = vld [vmem:[#allocation3 + $0x168] sm:$0xff]  }
  0x81   : > { %3748 = vmatprep.subr.bf16.mxu0 %v3973_v38  ;;  %1290 = vmatprep.mubr.bf16.mxu1 %v847_v58 }
  0x82   : > { %3549 = vmatpush3.bf16.msra.mxu1 %v3990_v32  ;;  %v417_v32 = vrot.slane %v408_v37, %v416_v26 }
  0x83   : > { %3550 = vmatprep.subr.bf16.mxu1 %v3992_v35 }
  0x84   : > { %3749 = vmatpush3.bf16.msra.mxu0 %v3973_v38  ;;  %v421_v38 = vrot.slane %v408_v37, %v420_v50 }
  0x85   : > { %3750 = vmatprep.subr.bf16.mxu0 %v3974_v60 }
  0x86   : > { %3551 = vmatpush3.bf16.msra.mxu1 %v3994_v39 }
  0x87   : > { %1226 = vmatmul.mubr.bf16.gmra.mrb[16].mxu0 %v844_v0  ;;  %1291 = vmatmul.mubr.bf16.gmra.mrb[16].mxu1 %v846_v2 }
  0x88   : > { %3751 = vmatpush3.bf16.msra.mxu0 %v3974_v60  ;;  %3754 = vmatprep.mubr.bf16.mxu0 %v833_v3 }
  0x89   : > { %3752 = vmatprep.subr.bf16.mxu0 %v3975_v1  ;;  %3552 = vmatprep.subr.bf16.mxu1 %v3996_v41 }
  0x8a   : > { %3553 = vmatpush3.bf16.msra.mxu1 %v3998_v43 }
  0x8b   : > { %3554 = vmatprep.subr.bf16.mxu1 %v4000_v45 }
  0x8c   : > { %3753 = vmatpush3.bf16.msra.mxu0 %v3975_v1 }
  0x8d   : > { %3582 = vmatprep.subr.bf16.mxu0 %v3977_v18 }
  0x8e   : > { %3555 = vmatpush3.bf16.msra.mxu1 %v4002_v47 }
  0x8f   : > { %3755 = vmatmul.mubr.bf16.vlgmr.msra.gmra.mrb[20].mxu0 %v838_v10  ;;  %3556 = vmatprep.subr.bf16.mxu1 %v4004_v13 }
  0x90   : > { %3758 = vmatprep.mubr.bf16.mxu0 %v843_v7  ;;  %3583 = vmatpush3.bf16.msra.mxu0 %v3979_v20 }
  0x91   : > { %3584 = vmatprep.subr.bf16.mxu0 %v3981_v22 }
  0x92   : > { %3557 = vmatpush3.bf16.msra.mxu1 %v4006_v49 }
  0x93   : > { %3762 = vmatprep.subr.bf16.mxu1 %v4641_v34 }
  0x94   : > { %3585 = vmatpush3.bf16.msra.mxu0 %v3983_v25 }
  0x95   : > { %3586 = vmatprep.subr.bf16.mxu0 %v3985_v27 }
  0x97   : > { %3759 = vmatmul.mubr.bf16.gmra.mrb[24].mxu0 %v848_v14 }
  0x98   : > { %3587 = vmatpush3.bf16.msra.mxu0 %v3987_v29  ;;  %v413_v29 = vrot.slane %v408_v37, %v4656_v19 }
  0x99   : > { %3588 = vmatprep.subr.bf16.mxu0 %v3989_v31 }
  0x9c   : > { %3589 = vmatpush3.bf16.msra.mxu0 %v3991_v33 }
  0x9d   : > { %3590 = vmatprep.subr.bf16.mxu0 %v3993_v36 }
  0xa0   : > { %3591 = vmatpush3.bf16.msra.mxu0 %v3995_v40 }
  0xa1   : > { %3592 = vmatprep.subr.bf16.mxu0 %v3997_v42 }
  0xa4   : > { %3593 = vmatpush3.bf16.msra.mxu0 %v3999_v44 }
  0xa5   : > { %3594 = vmatprep.subr.bf16.mxu0 %v4001_v46 }
  0xa8   : > { %3595 = vmatpush3.bf16.msra.mxu0 %v4003_v48 }
  0xa9   : > { %3596 = vmatprep.subr.bf16.mxu0 %v4005_v15 }
  0xac   : > { %3597 = vmatpush3.bf16.msra.mxu0 %v4007_v16 }
 0x122   : > { %v525_v55 = vpop.f32.mrb[0].mxu0  ;;  %v596_v53 = vpop.f32.mrb[0].mxu1 }
 0x123   : > { %v527_v56 = vpop.f32.mrb[1].mxu0  ;;  %v4649_v54 = vadd.f32 %v596_v53, %v421_v38  ;;  %v598_v57 = vpop.f32.mrb[1].mxu1  ;;  %v526_v41 = vadd.f32 %v525_v55, %v413_v29 }
 0x124   : > { %v4651_v58 = vadd.f32 %v598_v57, %v425_v52  ;;  %v528_v47 = vadd.f32 %v527_v56, %v417_v32 }
 0x125   : > { %v608_v13 = vrot.slane %v526_v41, %v4488_v23 }
 0x126   : > { %v633_v16 = vrot.slane %v528_v47, %v4488_v23 }
 0x127   : > { %v609_v55 = vcombine.high %v608_v13, %v608_v13 }
 0x142   : > { %v3466_v60 = vpop.f32.mrb[4].mxu0  ;;  %v3506_v59 = vpop.f32.mrb[4].mxu1 }
 0x143   : > { %v3467_v61 = vpop.f32.mrb[5].mxu0  ;;  %v3507_v63 = vpop.f32.mrb[5].mxu1 }
 0x144   : > { %v3468_v62 = vadd.f32 %v3467_v61, %v3466_v60  ;;  %v3469_v0 = vpop.f32.mrb[6].mxu0  ;;  %v3508_v1 = vadd.f32 %v3507_v63, %v3506_v59  ;;  %v3509_v2 = vpop.f32.mrb[6].mxu1  ;;  %v634_v61 = vcombine.high %v633_v16, %v633_v16 }
 0x145   : > { %v3470_v3 = vpop.f32.mrb[7].mxu0  ;;  %v3510_v6 = vpop.f32.mrb[7].mxu1 }
 0x146   : > { %v3471_v5 = vadd.f32 %v3470_v3, %v3469_v0  ;;  %v3511_v8 = vadd.f32 %v3510_v6, %v3509_v2  ;;  %v1269_v9 = vadd.f32 %v3508_v1, %v3468_v62  ;;  %v623_v0 = vrot.slane %v609_v55, %v4488_v23 }
 0x147   : > { %v616_v2 = vrot.slane %v608_v13, %v4488_v23  ;;  %v648_v6 = vrot.slane %v634_v61, %v4488_v23 }
 0x148   : > { %v4653_v10 = vadd.f32 %v3511_v8, %v3471_v5  ;;  %v3335_v5 = vld [vmem:[%s5038_s5] ss:$0 sm:$0xff] }
 0x149   : > { %v624_v26 = vcombine.high %v616_v2, %v616_v2  ;;  %v1414_v29 = vrot.slane %v648_v6, %v4656_v19 }
 0x14a   : > { %v3472_v7 = vpop.f32.mrb[8].mxu0  ;;  %v3512_v11 = vpop.f32.mrb[8].mxu1 }
 0x14b   : > { %v3473_v12 = vpop.f32.mrb[9].mxu0  ;;  %v3513_v17 = vpop.f32.mrb[9].mxu1 }
 0x14c   : > { %v3474_v14 = vadd.f32 %v3473_v12, %v3472_v7  ;;  %v3475_v18 = vpop.f32.mrb[10].mxu0  ;;  %v3514_v20 = vadd.f32 %v3513_v17, %v3512_v11  ;;  %v3515_v21 = vpop.f32.mrb[10].mxu1  ;;  %v641_v11 = vrot.slane %v633_v16, %v4488_v23 }
 0x14d   : > { %v3476_v22 = vpop.f32.mrb[11].mxu0  ;;  %v3516_v25 = vpop.f32.mrb[11].mxu1 }
 0x14e   : > { %v3477_v24 = vadd.f32 %v3476_v22, %v3475_v18  ;;  %v3517_v27 = vadd.f32 %v3516_v25, %v3515_v21  ;;  %v1277_v28 = vadd.f32 %v3514_v20, %v3474_v14  ;;  %v1386_v18 = vrot.slane %v623_v0, %v4656_v19 }
 0x150   : > { %v1280_v30 = vadd.f32 %v3517_v27, %v3477_v24  ;;  %v1382_v24 = vrot.slane %v616_v2, %v4656_v19 }
 0x152   : > { %v3478_v31 = vpop.f32.mrb[12].mxu0  ;;  %v3518_v33 = vpop.f32.mrb[12].mxu1 }
 0x153   : > { %v3479_v35 = vpop.f32.mrb[13].mxu0  ;;  %v3519_v39 = vpop.f32.mrb[13].mxu1 }
 0x154   : > { %v3480_v36 = vadd.f32 %v3479_v35, %v3478_v31  ;;  %v3481_v40 = vpop.f32.mrb[14].mxu0  ;;  %v3520_v42 = vadd.f32 %v3519_v39, %v3518_v33  ;;  %v3521_v43 = vpop.f32.mrb[14].mxu1  ;;  %v1410_v31 = vrot.slane %v641_v11, %v4656_v19  ;;  %v625_v33 = vcombine.high %v623_v0, %v623_v0 }
 0x155   : > { %v3482_v44 = vpop.f32.mrb[15].mxu0  ;;  %v3522_v46 = vpop.f32.mrb[15].mxu1  ;;  %v650_v39 = vcombine.high %v648_v6, %v648_v6 }
 0x156   : > { %v3483_v45 = vadd.f32 %v3482_v44, %v3481_v40  ;;  %v3523_v4 = vadd.f32 %v3522_v46, %v3521_v43  ;;  %v1285_v48 = vadd.f32 %v3520_v42, %v3480_v36  ;;  %v1390_v46 = vrot.slane %v624_v26, %v4656_v19 }
 0x157   : > { %v1394_v13 = vrot.slane %v625_v33, %v4656_v19 }
 0x158   : > { %v4661_v15 = vadd.f32 %v3523_v4, %v3483_v45 }
 0x15a   : > { %v3484_v49 = vpop.f32.mrb[16].mxu0  ;;  %v3524_v50 = vpop.f32.mrb[16].mxu1 }
 0x15b   : > { %v3485_v51 = vpop.f32.mrb[17].mxu0  ;;  %v3525_v38 = vpop.f32.mrb[17].mxu1 }
 0x15c   : > { %v3486_v37 = vadd.f32 %v3485_v51, %v3484_v49  ;;  %v3487_v52 = vpop.f32.mrb[18].mxu0  ;;  %v3526_v53 = vadd.f32 %v3525_v38, %v3524_v50  ;;  %v3527_v57 = vpop.f32.mrb[18].mxu1 }
 0x15d   : > { %v3488_v60 = vpop.f32.mrb[19].mxu0  ;;  %v3528_v56 = vpop.f32.mrb[19].mxu1 }
 0x15e   : > { %v3489_v59 = vadd.f32 %v3488_v60, %v3487_v52  ;;  %v3529_v62 = vadd.f32 %v3528_v56, %v3527_v57  ;;  %v1293_v63 = vadd.f32 %v3526_v53, %v3486_v37  ;;  %v1422_v60 = vrot.slane %v650_v39, %v4656_v19 }
 0x160   : > { %v1296_v1 = vadd.f32 %v3529_v62, %v3489_v59 }
 0x162   : > { %v3756_v3 = vpop.f32.mrb[20].mxu0 }
 0x163   : > { %v1342_v8 = vadd.f32 %v3756_v3, %v1277_v28  ;;  %v1333_v7 = vpop.f32.mrb[21].mxu0 }
 0x164   : > { %v1334_v12 = vadd.f32 %v1333_v7, %v1269_v9  ;;  %v3757_v14 = vpop.f32.mrb[22].mxu0 }
 0x165   : > { %v1373_v17 = vadd.f32 %v3335_v5, %v1342_v8  ;;  %v1345_v20 = vadd.f32 %v3757_v14, %v1280_v30  ;;  %v1336_v21 = vpop.f32.mrb[23].mxu0  ;;  %v649_v30 = vcombine.high %v641_v11, %v641_v11 }
 0x166   : > { %v1371_v22 = vadd.f32 %v3335_v5, %v1334_v12  ;;  %v1337_v25 = vadd.f32 %v1336_v21, %v4653_v10 }
 0x167   : > { %v1401_v27 = vmul.f32 %v1386_v18, %v1373_v17  ;;  %v1374_v28 = vadd.f32 %v3335_v5, %v1345_v20  ;;  %v1418_v56 = vrot.slane %v649_v30, %v4656_v19 }
 0x168   : > { %v1399_v32 = vmul.f32 %v1382_v24, %v1371_v22  ;;  %v1372_v9 = vadd.f32 %v3335_v5, %v1337_v25 }
 0x169   : > { %v4676_v35 = vadd.f32 %v1414_v29, %v1401_v27  ;;  %v1402_v36 = vmul.f32 %v1386_v18, %v1374_v28 }
 0x16a   : > { %v4678_v40 = vadd.f32 %v1410_v31, %v1399_v32  ;;  %v1400_v41 = vmul.f32 %v1382_v24, %v1372_v9  ;;  %v3760_v42 = vpop.f32.mrb[24].mxu0 }
 0x16b   : > { %v3338_v10 = vmul.f32 -1.442695, %v4676_v35  ;;  %v4681_v43 = vadd.f32 %v1414_v29, %v1402_v36  ;;  %v1358_v44 = vadd.f32 %v3760_v42, %v1293_v63  ;;  %v1349_v45 = vpop.f32.mrb[25].mxu0 }
 0x16c   : > { %v3336_v47 = vmul.f32 -1.442695, %v4678_v40  ;;  %v4685_v4 = vadd.f32 %v1410_v31, %v1400_v41  ;;  %v1350_v49 = vadd.f32 %v1349_v45, %v1285_v48  ;;  %v3761_v16 = vpop.f32.mrb[26].mxu0 }
 0x16d   : > { %4056 = vpow2.f32 %v3338_v10  ;;  %v3339_v50 = vmul.f32 -1.442695, %v4681_v43  ;;  %v1377_v51 = vadd.f32 %v3335_v5, %v1358_v44  ;;  %v1361_v37 = vadd.f32 %v3761_v16, %v1296_v1  ;;  %v1352_v38 = vpop.f32.mrb[27].mxu0 }
 0x16e   : > { %4058 = vpow2.f32 %v3336_v47  ;;  %v3337_v52 = vmul.f32 -1.442695, %v4685_v4  ;;  %v1375_v55 = vadd.f32 %v3335_v5, %v1350_v49  ;;  %v1353_v53 = vadd.f32 %v1352_v38, %v4661_v15 }
 0x16f   : > { %4060 = vpow2.f32 %v3339_v50  ;;  %v1405_v57 = vmul.f32 %v1394_v13, %v1377_v51  ;;  %v1378_v59 = vadd.f32 %v3335_v5, %v1361_v37 }
 0x170   : > { %4062 = vpow2.f32 %v3337_v52  ;;  %v1403_v48 = vmul.f32 %v1390_v46, %v1375_v55  ;;  %v1376_v61 = vadd.f32 %v3335_v5, %v1353_v53 }
 0x171   : > { %v1433_v62 = vadd.f32 %v1422_v60, %v1405_v57  ;;  %v1406_v63 = vmul.f32 %v1394_v13, %v1378_v59 }
 0x172   : > { %v1431_v0 = vadd.f32 %v1418_v56, %v1403_v48  ;;  %v1404_v1 = vmul.f32 %v1390_v46, %v1376_v61 }
 0x173   : > { %v3342_v2 = vmul.f32 -1.442695, %v1433_v62  ;;  %v1434_v3 = vadd.f32 %v1422_v60, %v1406_v63 }
 0x174   : > { %v3340_v6 = vmul.f32 -1.442695, %v1431_v0  ;;  %v1432_v8 = vadd.f32 %v1418_v56, %v1404_v1 }
 0x175   : > { %4064 = vpow2.f32 %v3342_v2  ;;  %v3343_v15 = vmul.f32 -1.442695, %v1434_v3 }
 0x176   : > { %4066 = vpow2.f32 %v3340_v6  ;;  %v3341_v7 = vmul.f32 -1.442695, %v1432_v8 }
 0x177   : > { %v4057_v11 = vpop.eup %4056  ;;  %4068 = vpow2.f32 %v3343_v15 }
 0x178   : > { %v4059_v12 = vpop.eup %4058  ;;  %v1461_v14 = vadd.f32 1.0, %v4057_v11  ;;  %4070 = vpow2.f32 %v3341_v7 }
 0x179   : > { %v4061_v17 = vpop.eup %4060  ;;  %v1459_v18 = vadd.f32 1.0, %v4059_v12 }
 0x17a   : > { %v4063_v5 = vpop.eup %4062  ;;  %4072 = vrcp.f32 %v1461_v14  ;;  %v1462_v20 = vadd.f32 1.0, %v4061_v17 }
 0x17b   : > { %4074 = vrcp.f32 %v1459_v18  ;;  %v1460_v21 = vadd.f32 1.0, %v4063_v5 }
 0x17c   : > { %4076 = vrcp.f32 %v1462_v20 }
 0x17d   : > { %4078 = vrcp.f32 %v1460_v21  ;;  %v4009_v21 = vld [vmem:[#allocation3 + $0x248] sm:$0xff]  }
 0x17f   : > { %v4065_v22 = vpop.eup %4064 }
 0x180   : > { %v4067_v24 = vpop.eup %4066  ;;  %v1465_v25 = vadd.f32 1.0, %v4065_v22 }
 0x181   : > { %v4069_v26 = vpop.eup %4068  ;;  %v1463_v27 = vadd.f32 1.0, %v4067_v24 }
 0x182   : > { %v4071_v29 = vpop.eup %4070  ;;  %4080 = vrcp.f32 %v1465_v25  ;;  %v1466_v28 = vadd.f32 1.0, %v4069_v26 }
 0x183   : > { %4082 = vrcp.f32 %v1463_v27  ;;  %v1464_v31 = vadd.f32 1.0, %v4071_v29 }
 0x184   : > { %v4073_v32 = vpop.eup %4072  ;;  %4084 = vrcp.f32 %v1466_v28 }
 0x185   : > { %v4075_v9 = vpop.eup %4074  ;;  %v1485_v33 = vmul.f32 %v4073_v32, %v4676_v35  ;;  %4086 = vrcp.f32 %v1464_v31 }
 0x186   : > { %v4077_v36 = vpop.eup %4076  ;;  %v1483_v30 = vmul.f32 %v4075_v9, %v4678_v40 }
 0x187   : > { %v4079_v39 = vpop.eup %4078  ;;  %1493 = vst [vmem:[#allocation2 + $0x1a] sm:$0xff] %v1485_v33  ;;  %v1486_v41 = vmul.f32 %v4077_v36, %v4681_v43  ;;  %v4010_v33 = vld [vmem:[#allocation3 + $0x250] sm:$0xff]  }
 0x188   : > { %1491 = vst [vmem:[#allocation2 + $0x2] sm:$0xff] %v1483_v30  ;;  %v1484_v42 = vmul.f32 %v4079_v39, %v4685_v4 }
 0x189   : > { %1494 = vst [vmem:[#allocation2 + $0x22] sm:$0xff] %v1486_v41 }
 0x18a   : > { %1492 = vst [vmem:[#allocation2 + $0xa] sm:$0xff] %v1484_v42 }
 0x18c   : > { %v4081_v10 = vpop.eup %4080 }
 0x18d   : > { %v4083_v44 = vpop.eup %4082  ;;  %v1489_v45 = vmul.f32 %v4081_v10, %v1433_v62 }
 0x18e   : > { %v4085_v46 = vpop.eup %4084  ;;  %v1487_v47 = vmul.f32 %v4083_v44, %v1431_v0  ;;  %v4697_v13 = vld [vmem:[#allocation2 + $0x18] sm:$0xff] }
 0x18f   : > { %v4087_v35 = vpop.eup %4086  ;;  %1497 = vst [vmem:[#allocation2 + $0x4a] sm:$0xff] %v1489_v45  ;;  %v1490_v49 = vmul.f32 %v4085_v46, %v1434_v3  ;;  %v4699_v40 = vld [vmem:[#allocation2] sm:$0xff]  ;;  %v1528_v16 = vrot.slane %v4697_v13, 1  ;;  %v1584_v43 = vrot.slane %v4697_v13, 3  ;;  %v1556_v28 = vrot.slane %v4697_v13, 2 }
 0x190   : > { %1495 = vst [vmem:[#allocation2 + $0x32] sm:$0xff] %v1487_v47  ;;  %v1488_v4 = vmul.f32 %v4087_v35, %v1432_v8  ;;  %v1523_v50 = vrot.slane %v4699_v40, 1  ;;  %v1579_v51 = vrot.slane %v4699_v40, 3  ;;  %v1551_v37 = vrot.slane %v4699_v40, 2  ;;  %v4706_v38 = vld [vmem:[#allocation2 + $0x20] sm:$0xff] }
 0x191   : > { %v4708_v52 = vld [vmem:[#allocation2 + $0x28] sm:$0xf]  ;;  %1498 = vst [vmem:[#allocation2 + $0x52] sm:$0xff] %v1490_v49  ;;  %v4712_v53 = vld [vmem:[#allocation2 + $0x10] sm:$0xf]  ;;  %v1529_v57 = vrot.slane %v4706_v38, 1 }
 0x192   : > { %v4710_v55 = vld [vmem:[#allocation2 + $0x8] sm:$0xff]  ;;  %v1531_v60 = vrot.slane %v4708_v52, 1  ;;  %v1585_v59 = vrot.slane %v4706_v38, 3  ;;  %1496 = vst [vmem:[#allocation2 + $0x3a] sm:$0xff] %v1488_v4  ;;  %v1526_v56 = vrot.slane %v4712_v53, 1  ;;  %v1582_v62 = vrot.slane %v4712_v53, 3 }
 0x193   : > { %v1524_v48 = vrot.slane %v4710_v55, 1  ;;  %v1580_v61 = vrot.slane %v4710_v55, 3  ;;  %v1635_v63 = vpack.c.bf16 %v4710_v55, %v4699_v40  ;;  %v1552_v0 = vrot.slane %v4710_v55, 2 }
 0x194   : > { %v1554_v1 = vrot.slane %v4712_v53, 2  ;;  %v1530_v2 = vsel %vm713_vm0, %v1528_v16, %v1529_v57  ;;  %v1532_v18 = vsel %vm713_vm0, %v1529_v57, %v1531_v60  ;;  %v1586_v5 = vsel %vm771_vm1, %v1584_v43, %v1585_v59 }
 0x195   : > { %v1525_v3 = vsel %vm713_vm0, %v1523_v50, %v1524_v48  ;;  %v1527_v6 = vsel %vm713_vm0, %v1524_v48, %v1526_v56  ;;  %v1581_v8 = vsel %vm771_vm1, %v1579_v51, %v1580_v61  ;;  %v1583_v15 = vsel %vm771_vm1, %v1580_v61, %v1582_v62  ;;  %v4011_v51 = vld [vmem:[#allocation3 + $0x258] sm:$0xff]  }
 0x196   : > { %v1636_v7 = vpack.c.bf16 %v1527_v6, %v1525_v3  ;;  %v1638_v11 = vpack.c.bf16 %v1583_v15, %v1581_v8  ;;  %v1553_v12 = vsel %vm742_vm2, %v1551_v37, %v1552_v0  ;;  %v1555_v14 = vsel %vm742_vm2, %v1552_v0, %v1554_v1  ;;  %v4766_v60 = vld [vmem:[#allocation2 + $0x48] sm:$0xff]  ;;  %v4012_v3 = vld [vmem:[#allocation3 + $0x260] sm:$0xff]  }
 0x197   : > { %v1637_v17 = vpack.c.bf16 %v1555_v14, %v1553_v12  ;;  %v1587_v20 = vrot.slane %v4708_v52, 3  ;;  %v1641_v22 = vpack.c.bf16 %v1532_v18, %v1530_v2  ;;  %v1557_v24 = vrot.slane %v4706_v38, 2  ;;  %v4737_v26 = vld [vmem:[#allocation2 + $0x30] sm:$0xff]  ;;  %v4013_v18 = vld [vmem:[#allocation3 + $0x268] sm:$0xff]  }
 0x198   : > { %2008 = vmatprep.mubr.bf16.mxu1 %v1636_v7  ;;  %2073 = vmatprep.mubr.bf16.mxu0 %v1638_v11  ;;  %v1559_v25 = vrot.slane %v4708_v52, 2  ;;  %v1533_v9 = vrot.slane %v4737_v26, 1  ;;  %v1589_v39 = vrot.slane %v4737_v26, 3  ;;  %v4758_v35 = vld [vmem:[#allocation2 + $0x50] sm:$0xff]  ;;  %v4760_v49 = vld [vmem:[#allocation2 + $0x58] sm:$0xf]  ;;  %v1640_v16 = vpack.c.bf16 %v4706_v38, %v4697_v13 }
 0x199   : > { %2009 = vmatmul.mubr.bf16.vlgmr.msra.gmra.mrb[20].mxu1 %v1635_v63  ;;  %2074 = vmatmul.mubr.bf16.vlgmr.msra.gmra.mrb[28].mxu0 %v1637_v17  ;;  %v1588_v27 = vsel %vm771_vm1, %v1585_v59, %v1587_v20  ;;  %v4742_v31 = vld [vmem:[#allocation2 + $0x38] sm:$0xff]  ;;  %v4744_v32 = vld [vmem:[#allocation2 + $0x40] sm:$0xf]  ;;  %v1539_v59 = vrot.slane %v4758_v35, 1  ;;  %v1541_v48 = vrot.slane %v4760_v49, 1  ;;  %v1595_v56 = vrot.slane %v4758_v35, 3 }
 0x19a   : > { %2016 = vmatprep.mubr.bf16.mxu1 %v1641_v22  ;;  %v1643_v29 = vpack.c.bf16 %v1588_v27, %v1586_v5  ;;  %3763 = vmatpush3.bf16.msra.mxu1 %v4641_v34  ;;  %v1534_v36 = vrot.slane %v4742_v31, 1  ;;  %v1536_v30 = vrot.slane %v4744_v32, 1  ;;  %v1590_v41 = vrot.slane %v4742_v31, 3 }
 0x19b   : > { %3764 = vmatprep.subr.bf16.mxu1 %v4009_v21  ;;  %v1558_v34 = vsel %vm742_vm2, %v1556_v28, %v1557_v24  ;;  %v1560_v42 = vsel %vm742_vm2, %v1557_v24, %v1559_v25  ;;  %v1592_v10 = vrot.slane %v4744_v32, 3  ;;  %v1562_v37 = vrot.slane %v4742_v31, 2  ;;  %v4014_v28 = vld [vmem:[#allocation3 + $0x270] sm:$0xff]  }
 0x19c   : > { %2081 = vmatprep.mubr.bf16.mxu0 %v1643_v29  ;;  %v1535_v44 = vsel %vm713_vm0, %v1533_v9, %v1534_v36  ;;  %v1537_v45 = vsel %vm713_vm0, %v1534_v36, %v1536_v30  ;;  %v1591_v46 = vsel %vm771_vm1, %v1589_v39, %v1590_v41  ;;  %v1642_v43 = vpack.c.bf16 %v1560_v42, %v1558_v34  ;;  %v4015_v30 = vld [vmem:[#allocation3 + $0x278] sm:$0xff]  }
 0x19d   : > { %v1593_v47 = vsel %vm771_vm1, %v1590_v41, %v1592_v10  ;;  %v1646_v4 = vpack.c.bf16 %v1537_v45, %v1535_v44  ;;  %v1564_v57 = vrot.slane %v4744_v32, 2  ;;  %v1597_v61 = vrot.slane %v4760_v49, 3 }
 0x19e   : > { %3765 = vmatpush3.bf16.msra.mxu1 %v4009_v21  ;;  %v1648_v50 = vpack.c.bf16 %v1593_v47, %v1591_v46  ;;  %v1561_v62 = vrot.slane %v4737_v26, 2  ;;  %v1538_v63 = vrot.slane %v4766_v60, 1  ;;  %v1594_v0 = vrot.slane %v4766_v60, 3 }
 0x19f   : > { %3766 = vmatprep.subr.bf16.mxu1 %v4010_v33  ;;  %v1565_v2 = vsel %vm742_vm2, %v1562_v37, %v1564_v57  ;;  %v1542_v8 = vsel %vm713_vm0, %v1539_v59, %v1541_v48  ;;  %v1598_v7 = vsel %vm771_vm1, %v1595_v56, %v1597_v61  ;;  %v1645_v11 = vpack.c.bf16 %v4742_v31, %v4737_v26  ;;  %v4022_v57 = vld [vmem:[#allocation3 + $0x288] sm:$0xff]   ;;  %v4025_v48 = vld [vmem:[#allocation3 + $0x350] sm:$0xff]  }
 0x1a0   : > { %v1563_v1 = vsel %vm742_vm2, %v1561_v62, %v1562_v37  ;;  %v1540_v6 = vsel %vm713_vm0, %v1538_v63, %v1539_v59  ;;  %v1596_v15 = vsel %vm771_vm1, %v1594_v0, %v1595_v56  ;;  %v1567_v5 = vrot.slane %v4758_v35, 2  ;;  %v4019_v37 = vld [vmem:[#allocation3 + $0x300] sm:$0xff]   ;;  %v4023_v59 = vld [vmem:[#allocation3 + $0x308] sm:$0xff]   ;;  %v4026_v56 = vld [vmem:[#allocation3 + $0x290] sm:$0xff]  }
 0x1a1   : > { %2017 = vmatmul.mubr.bf16.gmra.mrb[24].mxu1 %v1640_v16  ;;  %2082 = vmatmul.mubr.bf16.gmra.mrb[32].mxu0 %v1642_v43  ;;  %v1647_v12 = vpack.c.bf16 %v1565_v2, %v1563_v1  ;;  %v1651_v14 = vpack.c.bf16 %v1542_v8, %v1540_v6  ;;  %v1653_v17 = vpack.c.bf16 %v1598_v7, %v1596_v15  ;;  %v1569_v20 = vrot.slane %v4760_v49, 2  ;;  %v4027_v61 = vld [vmem:[#allocation3 + $0x310] sm:$0xff]   ;;  %v4028_v62 = vld [vmem:[#allocation3 + $0x2d8] sm:$0xff]   ;;  %v4032_v2 = vld [vmem:[#allocation3 + $0x2e0] sm:$0xff]  }
 0x1a2   : > { %2024 = vmatprep.mubr.bf16.mxu1 %v1646_v4  ;;  %2089 = vmatprep.mubr.bf16.mxu0 %v1648_v50  ;;  %v1608_v21 = vrot.slane %v4710_v55, 4  ;;  %v1610_v22 = vrot.slane %v4712_v53, 4  ;;  %v1566_v24 = vrot.slane %v4766_v60, 2  ;;  %v1607_v25 = vrot.slane %v4699_v40, 4  ;;  %v4016_v4 = vld [vmem:[#allocation3 + $0x2c0] sm:$0xff]   ;;  %v4029_v63 = vld [vmem:[#allocation3 + $0x358] sm:$0xff]  }
 0x1a3   : > { %3767 = vmatpush3.bf16.msra.mxu1 %v4010_v33  ;;  %v1570_v29 = vsel %vm742_vm2, %v1567_v5, %v1569_v20  ;;  %v1650_v55 = vpack.c.bf16 %v4758_v35, %v4766_v60  ;;  %v1613_v40 = vrot.slane %v4706_v38, 4  ;;  %v1615_v39 = vrot.slane %v4708_v52, 4  ;;  %v4017_v50 = vld [vmem:[#allocation3 + $0x340] sm:$0xff]   ;;  %3634 = vmatprep.subr.bf16.mxu0 %v4016_v4  ;;  %v4030_v0 = vld [vmem:[#allocation3 + $0x298] sm:$0xff]   ;;  %v4036_v15 = vld [vmem:[#allocation3 + $0x2e8] sm:$0xff]  }
 0x1a4   : > { %3768 = vmatprep.subr.bf16.mxu1 %v4011_v51  ;;  %v1568_v27 = vsel %vm742_vm2, %v1566_v24, %v1567_v5  ;;  %v1609_v9 = vsel %vm800_vm3, %v1607_v25, %v1608_v21  ;;  %v1611_v33 = vsel %vm800_vm3, %v1608_v21, %v1610_v22  ;;  %v1618_v41 = vrot.slane %v4742_v31, 4  ;;  %v4031_v1 = vld [vmem:[#allocation3 + $0x318] sm:$0xff]   ;;  %v4034_v6 = vld [vmem:[#allocation3 + $0x2a0] sm:$0xff]   ;;  %v4037_v7 = vld [vmem:[#allocation3 + $0x368] sm:$0xff]  }
 0x1a5   : > { %v1652_v53 = vpack.c.bf16 %v1570_v29, %v1568_v27  ;;  %v1639_v36 = vpack.c.bf16 %v1611_v33, %v1609_v9  ;;  %v1620_v34 = vrot.slane %v4744_v32, 4  ;;  %v1612_v42 = vrot.slane %v4697_v13, 4  ;;  %v4035_v8 = vld [vmem:[#allocation3 + $0x320] sm:$0xff]   ;;  %v4043_v5 = vld [vmem:[#allocation3 + $0x330] sm:$0xff]   ;;  %v4044_v20 = vld [vmem:[#allocation3 + $0x2f8] sm:$0xff]  }
 0x1a6   : > { %v1617_v10 = vrot.slane %v4737_v26, 4  ;;  %v1616_v45 = vsel %vm800_vm3, %v1613_v40, %v1615_v39  ;;  %v1623_v31 = vrot.slane %v4758_v35, 4  ;;  %v1625_v32 = vrot.slane %v4760_v49, 4  ;;  %v4020_v35 = vld [vmem:[#allocation3 + $0x2c8] sm:$0xff]   ;;  %v4045_v21 = vld [vmem:[#allocation3 + $0x378] sm:$0xff]   ;;  %v4810_v25 = vld [vmem:[#allocation3 + $0x380] sm:$0xff]  }
 0x1a7   : > { %3769 = vmatpush3.bf16.msra.mxu1 %v4011_v51  ;;  %v1614_v44 = vsel %vm800_vm3, %v1612_v42, %v1613_v40  ;;  %v1621_v38 = vsel %vm800_vm3, %v1618_v41, %v1620_v34  ;;  %v1622_v13 = vrot.slane %v4766_v60, 4  ;;  %v4018_v51 = vld [vmem:[#allocation3 + $0x280] sm:$0xff]   ;;  %v4021_v49 = vld [vmem:[#allocation3 + $0x348] sm:$0xff]   ;;  %v4024_v60 = vld [vmem:[#allocation3 + $0x2d0] sm:$0xff]  }
 0x1a8   : > { %3770 = vmatprep.subr.bf16.mxu1 %v4012_v3  ;;  %v1619_v46 = vsel %vm800_vm3, %v1617_v10, %v1618_v41  ;;  %v1644_v52 = vpack.c.bf16 %v1616_v45, %v1614_v44  ;;  %v1626_v16 = vsel %vm800_vm3, %v1623_v31, %v1625_v32  ;;  %3635 = vmatpush3.bf16.msra.mxu0 %v4018_v51  ;;  %v4046_v22 = vld [vmem:[#allocation3 + $0x2b8] sm:$0xff]  }
 0x1a9   : > { %2025 = vmatmul.mubr.bf16.gmra.mrb[28].mxu1 %v1645_v11  ;;  %2090 = vmatmul.mubr.bf16.gmra.mrb[36].mxu0 %v1647_v12  ;;  %v1649_v47 = vpack.c.bf16 %v1621_v38, %v1619_v46  ;;  %v1624_v26 = vsel %vm800_vm3, %v1622_v13, %v1623_v31  ;;  %v4038_v11 = vld [vmem:[#allocation3 + $0x2a8] sm:$0xff]   ;;  %v4047_v24 = vld [vmem:[#allocation3 + $0x338] sm:$0xff]  }
 0x1aa   : > { %2032 = vmatprep.mubr.bf16.mxu1 %v1651_v14  ;;  %2097 = vmatprep.mubr.bf16.mxu0 %v1653_v17  ;;  %v1654_v43 = vpack.c.bf16 %v1626_v16, %v1624_v26  ;;  %v4039_v12 = vld [vmem:[#allocation3 + $0x328] sm:$0xff]   ;;  %v4040_v14 = vld [vmem:[#allocation3 + $0x2f0] sm:$0xff]  }
 0x1ab   : > { %3771 = vmatpush3.bf16.msra.mxu1 %v4012_v3  ;;  %3636 = vmatprep.subr.bf16.mxu0 %v4020_v35  ;;  %v4033_v3 = vld [vmem:[#allocation3 + $0x360] sm:$0xff]   ;;  %v4041_v17 = vld [vmem:[#allocation3 + $0x370] sm:$0xff]  }
 0x1ac   : > { %3772 = vmatprep.subr.bf16.mxu1 %v4013_v18  ;;  %3637 = vmatpush3.bf16.msra.mxu0 %v4022_v57 }
 0x1ad   : > { %3638 = vmatprep.subr.bf16.mxu0 %v4024_v60 }
 0x1af   : > { %3773 = vmatpush3.bf16.msra.mxu1 %v4013_v18  ;;  %v4042_v18 = vld [vmem:[#allocation3 + $0x2b0] sm:$0xff]  }
 0x1b0   : > { %3774 = vmatprep.subr.bf16.mxu1 %v4014_v28  ;;  %3639 = vmatpush3.bf16.msra.mxu0 %v4026_v56 }
 0x1b1   : > { %2033 = vmatmul.mubr.bf16.gmra.mrb[32].mxu1 %v1650_v55  ;;  %2098 = vmatmul.mubr.bf16.gmra.mrb[40].mxu0 %v1652_v53 }
 0x1b2   : > { %3778 = vmatprep.mubr.bf16.mxu1 %v1639_v36  ;;  %3640 = vmatprep.subr.bf16.mxu0 %v4028_v62 }
 0x1b3   : > { %3775 = vmatpush3.bf16.msra.mxu1 %v4014_v28 }
 0x1b4   : > { %3776 = vmatprep.subr.bf16.mxu1 %v4015_v30  ;;  %3641 = vmatpush3.bf16.msra.mxu0 %v4030_v0 }
 0x1b5   : > { %3642 = vmatprep.subr.bf16.mxu0 %v4032_v2 }
 0x1b7   : > { %3777 = vmatpush3.bf16.msra.mxu1 %v4015_v30 }
 0x1b8   : > { %3674 = vmatprep.subr.bf16.mxu1 %v4017_v50  ;;  %3643 = vmatpush3.bf16.msra.mxu0 %v4034_v6 }
 0x1b9   : > { %3644 = vmatprep.subr.bf16.mxu0 %v4036_v15  ;;  %v683_v15 = vrot.slane %v4651_v58, %v4488_v23  ;;  %v3385_v58 = vld [vmem:[%s5038_s5 + $0x1] ss:$0 sm:$0xff] }
 0x1ba   : > { %3779 = vmatmul.mubr.bf16.vlgmr.msra.gmra.mrb[36].mxu1 %v1644_v52 }
 0x1bb   : > { %3782 = vmatprep.mubr.bf16.mxu1 %v1649_v47  ;;  %3675 = vmatpush3.bf16.msra.mxu1 %v4019_v37 }
 0x1bc   : > { %3676 = vmatprep.subr.bf16.mxu1 %v4021_v49  ;;  %3645 = vmatpush3.bf16.msra.mxu0 %v4038_v11 }
 0x1bd   : > { %3646 = vmatprep.subr.bf16.mxu0 %v4040_v14 }
 0x1bf   : > { %3677 = vmatpush3.bf16.msra.mxu1 %v4023_v59 }
 0x1c0   : > { %3678 = vmatprep.subr.bf16.mxu1 %v4025_v48  ;;  %3647 = vmatpush3.bf16.msra.mxu0 %v4042_v18 }
 0x1c1   : > { %3648 = vmatprep.subr.bf16.mxu0 %v4044_v20 }
 0x1c2   : > { %3783 = vmatmul.mubr.bf16.gmra.mrb[40].mxu1 %v1654_v43 }
 0x1c3   : > { %3679 = vmatpush3.bf16.msra.mxu1 %v4027_v61 }
 0x1c4   : > { %3680 = vmatprep.subr.bf16.mxu1 %v4029_v63  ;;  %3649 = vmatpush3.bf16.msra.mxu0 %v4046_v22 }
 0x1c5   : > { %3786 = vmatprep.subr.bf16.mxu0 %v4810_v25 }
 0x1c7   : > { %3681 = vmatpush3.bf16.msra.mxu1 %v4031_v1  ;;  %v658_v1 = vrot.slane %v4649_v54, %v4488_v23 }
 0x1c8   : > { %3682 = vmatprep.subr.bf16.mxu1 %v4033_v3 }
 0x1cb   : > { %3683 = vmatpush3.bf16.msra.mxu1 %v4035_v8 }
 0x1cc   : > { %3684 = vmatprep.subr.bf16.mxu1 %v4037_v7 }
 0x1cf   : > { %3685 = vmatpush3.bf16.msra.mxu1 %v4039_v12 }
 0x1d0   : > { %3686 = vmatprep.subr.bf16.mxu1 %v4041_v17 }
 0x1d3   : > { %3687 = vmatpush3.bf16.msra.mxu1 %v4043_v5  ;;  %v659_v5 = vcombine.high %v658_v1, %v658_v1 }
 0x1d4   : > { %3688 = vmatprep.subr.bf16.mxu1 %v4045_v21 }
 0x1d5   : > { %v673_v54 = vrot.slane %v659_v5, %v4488_v23 }
 0x1d7   : > { %3689 = vmatpush3.bf16.msra.mxu1 %v4047_v24  ;;  %v684_v24 = vcombine.high %v683_v15, %v683_v15 }
 0x26c   : > { %v3558_v27 = vpop.f32.mrb[20].mxu1  ;;  %v3598_v29 = vpop.f32.mrb[28].mxu0 }
 0x26d   : > { %v3559_v28 = vpop.f32.mrb[21].mxu1  ;;  %v3599_v9 = vpop.f32.mrb[29].mxu0 }
 0x26e   : > { %v3560_v33 = vadd.f32 %v3559_v28, %v3558_v27  ;;  %v3600_v55 = vadd.f32 %v3599_v9, %v3598_v29  ;;  %v3561_v53 = vpop.f32.mrb[22].mxu1  ;;  %v3601_v36 = vpop.f32.mrb[30].mxu0  ;;  %v666_v29 = vrot.slane %v658_v1, %v4488_v23  ;;  %v698_v9 = vrot.slane %v684_v24, %v4488_v23 }
 0x26f   : > { %v3562_v30 = vpop.f32.mrb[23].mxu1  ;;  %v3602_v40 = vpop.f32.mrb[31].mxu0 }
 0x270   : > { %v3563_v39 = vadd.f32 %v3562_v30, %v3561_v53  ;;  %v3603_v41 = vadd.f32 %v3602_v40, %v3601_v36  ;;  %v2076_v34 = vadd.f32 %v3600_v55, %v3560_v33  ;;  %v691_v53 = vrot.slane %v683_v15, %v4488_v23 }
 0x272   : > { %v4813_v42 = vadd.f32 %v3603_v41, %v3563_v39  ;;  %v2194_v39 = vrot.slane %v673_v54, %v4656_v19 }
 0x274   : > { %v3564_v10 = vpop.f32.mrb[24].mxu1  ;;  %v3604_v44 = vpop.f32.mrb[32].mxu0 }
 0x275   : > { %v3565_v45 = vpop.f32.mrb[25].mxu1  ;;  %v3605_v46 = vpop.f32.mrb[33].mxu0 }
 0x276   : > { %v3566_v38 = vadd.f32 %v3565_v45, %v3564_v10  ;;  %v3606_v52 = vadd.f32 %v3605_v46, %v3604_v44  ;;  %v3567_v47 = vpop.f32.mrb[26].mxu1  ;;  %v3607_v31 = vpop.f32.mrb[34].mxu0  ;;  %v2190_v45 = vrot.slane %v666_v29, %v4656_v19 }
 0x277   : > { %v3568_v32 = vpop.f32.mrb[27].mxu1  ;;  %v3608_v13 = vpop.f32.mrb[35].mxu0 }
 0x278   : > { %v3569_v26 = vadd.f32 %v3568_v32, %v3567_v47  ;;  %v3609_v16 = vadd.f32 %v3608_v13, %v3607_v31  ;;  %v2084_v43 = vadd.f32 %v3606_v52, %v3566_v38  ;;  %v674_v38 = vcombine.high %v666_v29, %v666_v29 }
 0x279   : > { %v2222_v47 = vrot.slane %v698_v9, %v4656_v19  ;;  %v2218_v32 = vrot.slane %v691_v53, %v4656_v19  ;;  %v675_v13 = vcombine.high %v673_v54, %v673_v54 }
 0x27a   : > { %v2087_v4 = vadd.f32 %v3609_v16, %v3569_v26 }
 0x27c   : > { %v3570_v50 = vpop.f32.mrb[28].mxu1  ;;  %v3610_v51 = vpop.f32.mrb[36].mxu0 }
 0x27d   : > { %v3571_v37 = vpop.f32.mrb[29].mxu1  ;;  %v3611_v35 = vpop.f32.mrb[37].mxu0 }
 0x27e   : > { %v3572_v49 = vadd.f32 %v3571_v37, %v3570_v50  ;;  %v3612_v57 = vadd.f32 %v3611_v35, %v3610_v51  ;;  %v3573_v59 = vpop.f32.mrb[30].mxu1  ;;  %v3613_v60 = vpop.f32.mrb[38].mxu0 }
 0x27f   : > { %v3574_v48 = vpop.f32.mrb[31].mxu1  ;;  %v3614_v56 = vpop.f32.mrb[39].mxu0 }
 0x280   : > { %v3575_v61 = vadd.f32 %v3574_v48, %v3573_v59  ;;  %v3615_v62 = vadd.f32 %v3614_v56, %v3613_v60  ;;  %v2092_v63 = vadd.f32 %v3612_v57, %v3572_v49  ;;  %v2198_v59 = vrot.slane %v674_v38, %v4656_v19 }
 0x281   : > { %v2202_v56 = vrot.slane %v675_v13, %v4656_v19 }
 0x282   : > { %v4815_v0 = vadd.f32 %v3615_v62, %v3575_v61 }
 0x284   : > { %v3576_v2 = vpop.f32.mrb[32].mxu1  ;;  %v3616_v3 = vpop.f32.mrb[40].mxu0 }
 0x285   : > { %v3577_v6 = vpop.f32.mrb[33].mxu1  ;;  %v3617_v8 = vpop.f32.mrb[41].mxu0 }
 0x286   : > { %v3578_v7 = vadd.f32 %v3577_v6, %v3576_v2  ;;  %v3618_v11 = vadd.f32 %v3617_v8, %v3616_v3  ;;  %v3579_v12 = vpop.f32.mrb[34].mxu1  ;;  %v3619_v14 = vpop.f32.mrb[42].mxu0 }
 0x287   : > { %v3580_v17 = vpop.f32.mrb[35].mxu1  ;;  %v3620_v18 = vpop.f32.mrb[43].mxu0 }
 0x288   : > { %v3581_v20 = vadd.f32 %v3580_v17, %v3579_v12  ;;  %v3621_v21 = vadd.f32 %v3620_v18, %v3619_v14  ;;  %v2100_v22 = vadd.f32 %v3618_v11, %v3578_v7 }
 0x28a   : > { %v2103_v27 = vadd.f32 %v3621_v21, %v3581_v20 }
 0x28d   : > { %v3780_v28 = vpop.f32.mrb[36].mxu1 }
 0x28e   : > { %v2149_v33 = vadd.f32 %v3780_v28, %v2084_v43  ;;  %v2140_v55 = vpop.f32.mrb[37].mxu1  ;;  %v699_v43 = vcombine.high %v691_v53, %v691_v53 }
 0x28f   : > { %v2141_v36 = vadd.f32 %v2140_v55, %v2076_v34  ;;  %v3781_v30 = vpop.f32.mrb[38].mxu1 }
 0x290   : > { %v2181_v40 = vadd.f32 %v3385_v58, %v2149_v33  ;;  %v2152_v41 = vadd.f32 %v3781_v30, %v2087_v4  ;;  %v2143_v10 = vpop.f32.mrb[39].mxu1  ;;  %v700_v4 = vcombine.high %v698_v9, %v698_v9  ;;  %v2226_v17 = vrot.slane %v699_v43, %v4656_v19 }
 0x291   : > { %v2179_v44 = vadd.f32 %v3385_v58, %v2141_v36  ;;  %v2144_v46 = vadd.f32 %v2143_v10, %v4813_v42 }
 0x292   : > { %v2209_v52 = vmul.f32 %v2194_v39, %v2181_v40  ;;  %v2182_v31 = vadd.f32 %v3385_v58, %v2152_v41  ;;  %v2230_v12 = vrot.slane %v700_v4, %v4656_v19 }
 0x293   : > { %v2207_v23 = vmul.f32 %v2190_v45, %v2179_v44  ;;  %v2180_v34 = vadd.f32 %v3385_v58, %v2144_v46 }
 0x294   : > { %v4833_v26 = vadd.f32 %v2222_v47, %v2209_v52  ;;  %v2210_v16 = vmul.f32 %v2194_v39, %v2182_v31 }
 0x295   : > { %v4835_v50 = vadd.f32 %v2218_v32, %v2207_v23  ;;  %v2208_v51 = vmul.f32 %v2190_v45, %v2180_v34  ;;  %v3784_v37 = vpop.f32.mrb[40].mxu1 }
 0x296   : > { %v3388_v42 = vmul.f32 -1.442695, %v4833_v26  ;;  %v4838_v35 = vadd.f32 %v2222_v47, %v2210_v16  ;;  %v2165_v49 = vadd.f32 %v3784_v37, %v2100_v22  ;;  %v2156_v57 = vpop.f32.mrb[41].mxu1 }
 0x297   : > { %v3386_v60 = vmul.f32 -1.442695, %v4835_v50  ;;  %v4842_v48 = vadd.f32 %v2218_v32, %v2208_v51  ;;  %v2157_v61 = vadd.f32 %v2156_v57, %v2092_v63  ;;  %v3785_v62 = vpop.f32.mrb[42].mxu1  ;;  %v4152_v51 = vld [vmem:[%s4515_s8 + $0x18] sm:$0xff] }
 0x298   : > { %4088 = vpow2.f32 %v3388_v42  ;;  %v3389_v1 = vmul.f32 -1.442695, %v4838_v35  ;;  %v2185_v2 = vadd.f32 %v3385_v58, %v2165_v49  ;;  %v2168_v3 = vadd.f32 %v3785_v62, %v2103_v27  ;;  %v2159_v6 = vpop.f32.mrb[43].mxu1  ;;  %v4153_v49 = vld [vmem:[%s4515_s8] sm:$0xff]  ;;  %v4156_v62 = vld [vmem:[%s4515_s8 + $0x10] sm:$0xf] }
 0x299   : > { %4090 = vpow2.f32 %v3386_v60  ;;  %v3387_v8 = vmul.f32 -1.442695, %v4842_v48  ;;  %v2183_v15 = vadd.f32 %v3385_v58, %v2157_v61  ;;  %v2160_v7 = vadd.f32 %v2159_v6, %v4815_v0 }
 0x29a   : > { %4092 = vpow2.f32 %v3389_v1  ;;  %v2213_v11 = vmul.f32 %v2202_v56, %v2185_v2  ;;  %v2186_v14 = vadd.f32 %v3385_v58, %v2168_v3  ;;  %v4157_v3 = vld [vmem:[%s4515_s8 + $0x8] sm:$0xff] }
 0x29b   : > { %4094 = vpow2.f32 %v3387_v8  ;;  %v2211_v63 = vmul.f32 %v2198_v59, %v2183_v15  ;;  %v2184_v18 = vadd.f32 %v3385_v58, %v2160_v7 }
 0x29c   : > { %v4850_v5 = vadd.f32 %v2230_v12, %v2213_v11  ;;  %v2214_v20 = vmul.f32 %v2202_v56, %v2186_v14 }
 0x29d   : > { %v4852_v21 = vadd.f32 %v2226_v17, %v2211_v63  ;;  %v2212_v22 = vmul.f32 %v2198_v59, %v2184_v18  ;;  %v4154_v59 = vld [vmem:[%s4515_s8 + $0x28] sm:$0xf] }
 0x29e   : > { %v3392_v24 = vmul.f32 -1.442695, %v4850_v5  ;;  %v4855_v27 = vadd.f32 %v2230_v12, %v2214_v20  ;;  %v4158_v18 = vld [vmem:[%s4515_s8 + $0x48] sm:$0xff] }
 0x29f   : > { %v3390_v0 = vmul.f32 -1.442695, %v4852_v21  ;;  %v4858_v54 = vadd.f32 %v2226_v17, %v2212_v22  ;;  %v4159_v22 = vld [vmem:[%s4515_s8 + $0x30] sm:$0xff] }
 0x2a0   : > { %4096 = vpow2.f32 %v3392_v24  ;;  %v3393_v29 = vmul.f32 -1.442695, %v4855_v27 }
 0x2a1   : > { %4098 = vpow2.f32 %v3390_v0  ;;  %v3391_v19 = vmul.f32 -1.442695, %v4858_v54 }
 0x2a2   : > { %v4089_v28 = vpop.eup %4088  ;;  %4100 = vpow2.f32 %v3393_v29 }
 0x2a3   : > { %v4091_v58 = vpop.eup %4090  ;;  %v2269_v9 = vadd.f32 1.0, %v4089_v28  ;;  %4102 = vpow2.f32 %v3391_v19  ;;  %v4160_v19 = vld [vmem:[%s4515_s8 + $0x58] sm:$0xf] }
 0x2a4   : > { %v4093_v33 = vpop.eup %4092  ;;  %v2267_v55 = vadd.f32 1.0, %v4091_v58 }
 0x2a5   : > { %v4095_v53 = vpop.eup %4094  ;;  %4104 = vrcp.f32 %v2269_v9  ;;  %v2270_v36 = vadd.f32 1.0, %v4093_v33  ;;  %v4161_v33 = vld [vmem:[%s4515_s8 + $0x50] sm:$0xff] }
 0x2a6   : > { %4106 = vrcp.f32 %v2267_v55  ;;  %v2268_v30 = vadd.f32 1.0, %v4095_v53 }
 0x2a7   : > { %4108 = vrcp.f32 %v2270_v36  ;;  %v4162_v36 = vld [vmem:[%s4515_s8 + $0x40] sm:$0xf] }
 0x2a8   : > { %4110 = vrcp.f32 %v2268_v30 }
 0x2aa   : > { %v4097_v40 = vpop.eup %4096 }
 0x2ab   : > { %v4099_v39 = vpop.eup %4098  ;;  %v2273_v41 = vadd.f32 1.0, %v4097_v40 }
 0x2ac   : > { %v4101_v10 = vpop.eup %4100  ;;  %v2271_v44 = vadd.f32 1.0, %v4099_v39 }
 0x2ad   : > { %v4103_v45 = vpop.eup %4102  ;;  %4112 = vrcp.f32 %v2273_v41  ;;  %v2274_v46 = vadd.f32 1.0, %v4101_v10  ;;  %v4163_v41 = vld [vmem:[%s4515_s8 + $0x38] sm:$0xff] }
 0x2ae   : > { %4114 = vrcp.f32 %v2271_v44  ;;  %v2272_v38 = vadd.f32 1.0, %v4103_v45 }
 0x2af   : > { %v4105_v52 = vpop.eup %4104  ;;  %4116 = vrcp.f32 %v2274_v46 }
 0x2b0   : > { %v4107_v47 = vpop.eup %4106  ;;  %v2293_v31 = vmul.f32 %v4105_v52, %v4833_v26  ;;  %4118 = vrcp.f32 %v2272_v38 }
 0x2b1   : > { %v4109_v32 = vpop.eup %4108  ;;  %v2291_v23 = vmul.f32 %v4107_v47, %v4835_v50 }
 0x2b2   : > { %v4111_v34 = vpop.eup %4110  ;;  %v2311_v13 = vrot.slane %v2293_v31, 6  ;;  %v2294_v16 = vmul.f32 %v4109_v32, %v4838_v35  ;;  %v4155_v35 = vld [vmem:[%s4515_s8 + $0x20] sm:$0xff] }
 0x2b3   : > { %v2308_v43 = vrot.slane %v2291_v23, 6  ;;  %v2292_v4 = vmul.f32 %v4111_v34, %v4842_v48 }
 0x2b4   : > { %v2335_v37 = vadd.f32 %v4152_v51, %v2311_v13  ;;  %v2312_v42 = vrot.slane %v2294_v16, 6 }
 0x2b5   : > { %v2332_v26 = vadd.f32 %v4153_v49, %v2308_v43  ;;  %v2309_v57 = vrot.slane %v2292_v4, 6 }
 0x2b6   : > { %2347 = vst [vmem:[#allocation2 + $0x18] sm:$0xfc] %v2335_v37  ;;  %v2313_v50 = vsel %vm2307_vm4, %v2311_v13, %v2312_v42  ;;  %v2337_v60 = vadd.f32 %v4154_v59, %v2312_v42 }
 0x2b7   : > { %v4113_v56 = vpop.eup %4112  ;;  %2344 = vst [vmem:[#allocation2] sm:$0xfc] %v2332_v26  ;;  %v4871_v61 = vadd.f32 %v4155_v35, %v2313_v50  ;;  %v2310_v48 = vsel %vm2307_vm4, %v2308_v43, %v2309_v57  ;;  %v2334_v1 = vadd.f32 %v4156_v62, %v2309_v57  ;;  %v4049_v35 = vld [vmem:[#allocation3 + $0x388] sm:$0xff]  }
 0x2b8   : > { %v4115_v2 = vpop.eup %4114  ;;  %2349 = vst [vmem:[#allocation2 + $0x28] sm:$0x3] %v2337_v60  ;;  %v4876_v6 = vadd.f32 %v4157_v3, %v2310_v48  ;;  %v2297_v8 = vmul.f32 %v4113_v56, %v4850_v5 }
 0x2b9   : > { %v4117_v15 = vpop.eup %4116  ;;  %2348 = vst [vmem:[#allocation2 + $0x20] sm:$0xff] %v4871_v61  ;;  %2346 = vst [vmem:[#allocation2 + $0x10] sm:$0x3] %v2334_v1  ;;  %v2295_v7 = vmul.f32 %v4115_v2, %v4852_v21  ;;  %v2386_v21 = vrot.slane %v4871_v61, 1  ;;  %v2442_v60 = vrot.slane %v4871_v61, 3 }
 0x2ba   : > { %v4119_v11 = vpop.eup %4118  ;;  %2345 = vst [vmem:[#allocation2 + $0x8] sm:$0xff] %v4876_v6  ;;  %v2317_v12 = vrot.slane %v2297_v8, 6  ;;  %v2298_v14 = vmul.f32 %v4117_v15, %v4855_v27  ;;  %v2437_v58 = vrot.slane %v4876_v6, 3  ;;  %v2409_v38 = vrot.slane %v4876_v6, 2 }
 0x2bb   : > { %v2314_v63 = vrot.slane %v2295_v7, 6  ;;  %v2296_v17 = vmul.f32 %v4119_v11, %v4858_v54  ;;  %v2381_v54 = vrot.slane %v4876_v6, 1  ;;  %v2414_v7 = vrot.slane %v4871_v61, 2 }
 0x2bc   : > { %v2341_v20 = vadd.f32 %v4158_v18, %v2317_v12  ;;  %v2318_v5 = vrot.slane %v2298_v14, 6 }
 0x2bd   : > { %v2338_v24 = vadd.f32 %v4159_v22, %v2314_v63  ;;  %v2315_v0 = vrot.slane %v2296_v17, 6  ;;  %v4893_v9 = vld [vmem:[#allocation2 + $0x18] sm:$0xff] }
 0x2be   : > { %2353 = vst [vmem:[#allocation2 + $0x48] sm:$0xfc] %v2341_v20  ;;  %v2319_v29 = vsel %vm2307_vm4, %v2317_v12, %v2318_v5  ;;  %v2343_v28 = vadd.f32 %v4160_v19, %v2318_v5  ;;  %v4889_v27 = vld [vmem:[#allocation2] sm:$0xff]  ;;  %v2385_v32 = vrot.slane %v4893_v9, 1  ;;  %v2441_v16 = vrot.slane %v4893_v9, 3  ;;  %v4050_v12 = vld [vmem:[#allocation3 + $0x390] sm:$0xff]  }
 0x2bf   : > { %2350 = vst [vmem:[#allocation2 + $0x30] sm:$0xfc] %v2338_v24  ;;  %v4896_v55 = vadd.f32 %v4161_v33, %v2319_v29  ;;  %v2316_v53 = vsel %vm2307_vm4, %v2314_v63, %v2315_v0  ;;  %v2340_v30 = vadd.f32 %v4162_v36, %v2315_v0  ;;  %v2380_v40 = vrot.slane %v4889_v27, 1  ;;  %v4901_v39 = vld [vmem:[#allocation2 + $0x28] sm:$0xf] }
 0x2c0   : > { %2355 = vst [vmem:[#allocation2 + $0x58] sm:$0x3] %v2343_v28  ;;  %v4904_v10 = vadd.f32 %v4163_v41, %v2316_v53  ;;  %v4906_v44 = vld [vmem:[#allocation2 + $0x10] sm:$0xf]  ;;  %v2436_v45 = vrot.slane %v4889_v27, 3  ;;  %v2408_v46 = vrot.slane %v4889_v27, 2  ;;  %v2492_v50 = vpack.c.bf16 %v4876_v6, %v4889_v27 }
 0x2c1   : > { %2354 = vst [vmem:[#allocation2 + $0x50] sm:$0xff] %v4896_v55  ;;  %2352 = vst [vmem:[#allocation2 + $0x40] sm:$0x3] %v2340_v30  ;;  %v2383_v52 = vrot.slane %v4906_v44, 1  ;;  %v2439_v47 = vrot.slane %v4906_v44, 3  ;;  %v2411_v31 = vrot.slane %v4906_v44, 2  ;;  %v2382_v23 = vsel %vm713_vm0, %v2380_v40, %v2381_v54 }
 0x2c2   : > { %2351 = vst [vmem:[#allocation2 + $0x38] sm:$0xff] %v4904_v10  ;;  %v2438_v34 = vsel %vm771_vm1, %v2436_v45, %v2437_v58  ;;  %v2388_v13 = vrot.slane %v4901_v39, 1  ;;  %v2410_v51 = vsel %vm742_vm2, %v2408_v46, %v2409_v38  ;;  %v2387_v59 = vsel %vm713_vm0, %v2385_v32, %v2386_v21  ;;  %v4051_v53 = vld [vmem:[#allocation3 + $0x398] sm:$0xff]  }
 0x2c3   : > { %v2384_v43 = vsel %vm713_vm0, %v2381_v54, %v2383_v52  ;;  %v2440_v4 = vsel %vm771_vm1, %v2437_v58, %v2439_v47  ;;  %v2412_v37 = vsel %vm742_vm2, %v2409_v38, %v2411_v31  ;;  %v2444_v56 = vrot.slane %v4901_v39, 3 }
 0x2c4   : > { %v2493_v42 = vpack.c.bf16 %v2384_v43, %v2382_v23  ;;  %v2495_v49 = vpack.c.bf16 %v2440_v4, %v2438_v34  ;;  %v2494_v26 = vpack.c.bf16 %v2412_v37, %v2410_v51  ;;  %v2389_v57 = vsel %vm713_vm0, %v2386_v21, %v2388_v13  ;;  %v4052_v23 = vld [vmem:[#allocation3 + $0x3a0] sm:$0xff]  }
 0x2c5   : > { %v2498_v48 = vpack.c.bf16 %v2389_v57, %v2387_v59  ;;  %v2416_v62 = vrot.slane %v4901_v39, 2  ;;  %v2443_v2 = vsel %vm771_vm1, %v2441_v16, %v2442_v60  ;;  %v2445_v3 = vsel %vm771_vm1, %v2442_v60, %v2444_v56  ;;  %v4958_v30 = vld [vmem:[#allocation2 + $0x48] sm:$0xff] }
 0x2c6   : > { %2865 = vmatprep.mubr.bf16.mxu0 %v2493_v42  ;;  %2930 = vmatprep.mubr.bf16.mxu1 %v2495_v49  ;;  %v4932_v1 = vld [vmem:[#allocation2 + $0x30] sm:$0xff]  ;;  %v2500_v8 = vpack.c.bf16 %v2445_v3, %v2443_v2  ;;  %v2413_v15 = vrot.slane %v4893_v9, 2  ;;  %v2391_v63 = vrot.slane %v4904_v10, 1  ;;  %v2497_v29 = vpack.c.bf16 %v4871_v61, %v4893_v9 }
 0x2c7   : > { %2866 = vmatmul.mubr.bf16.vlgmr.msra.gmra.mrb[44].mxu0 %v2492_v50  ;;  %2931 = vmatmul.mubr.bf16.vlgmr.msra.gmra.mrb[44].mxu1 %v2494_v26  ;;  %v2390_v14 = vrot.slane %v4932_v1, 1  ;;  %v2446_v18 = vrot.slane %v4932_v1, 3  ;;  %v2417_v20 = vsel %vm742_vm2, %v2414_v7, %v2416_v62  ;;  %v4951_v21 = vld [vmem:[#allocation2 + $0x58] sm:$0xf]  ;;  %v2418_v45 = vrot.slane %v4932_v1, 2  ;;  %v4053_v26 = vld [vmem:[#allocation3 + $0x3a8] sm:$0xff]  }
 0x2c8   : > { %2873 = vmatprep.mubr.bf16.mxu0 %v2498_v48  ;;  %3787 = vmatpush3.bf16.msra.mxu0 %v4810_v25  ;;  %v4939_v11 = vld [vmem:[#allocation2 + $0x40] sm:$0xf]  ;;  %v2447_v25 = vrot.slane %v4904_v10, 3  ;;  %v2415_v24 = vsel %vm742_vm2, %v2413_v15, %v2414_v7  ;;  %v2398_v40 = vrot.slane %v4951_v21, 1  ;;  %v2454_v41 = vrot.slane %v4951_v21, 3  ;;  %v4054_v62 = vld [vmem:[#allocation3 + $0x3b0] sm:$0xff]  }
 0x2c9   : > { %3788 = vmatprep.subr.bf16.mxu0 %v4049_v35  ;;  %v2393_v17 = vrot.slane %v4939_v11, 1  ;;  %2938 = vmatprep.mubr.bf16.mxu1 %v2500_v8  ;;  %v2449_v5 = vrot.slane %v4939_v11, 3  ;;  %v2499_v19 = vpack.c.bf16 %v2417_v20, %v2415_v24  ;;  %v2392_v28 = vsel %vm713_vm0, %v2390_v14, %v2391_v63 }
 0x2ca   : > { %v2448_v54 = vsel %vm771_vm1, %v2446_v18, %v2447_v25  ;;  %v2421_v36 = vrot.slane %v4939_v11, 2  ;;  %v2419_v46 = vrot.slane %v4904_v10, 2  ;;  %v2395_v38 = vrot.slane %v4958_v30, 1 }
 0x2cb   : > { %v2394_v22 = vsel %vm713_vm0, %v2391_v63, %v2393_v17  ;;  %v2450_v0 = vsel %vm771_vm1, %v2447_v25, %v2449_v5  ;;  %v2396_v52 = vrot.slane %v4896_v55, 1  ;;  %v2451_v47 = vrot.slane %v4958_v30, 3 }
 0x2cc   : > { %3789 = vmatpush3.bf16.msra.mxu0 %v4049_v35  ;;  %v2503_v58 = vpack.c.bf16 %v2394_v22, %v2392_v28  ;;  %v2505_v33 = vpack.c.bf16 %v2450_v0, %v2448_v54  ;;  %v2452_v31 = vrot.slane %v4896_v55, 3  ;;  %v2422_v32 = vsel %vm742_vm2, %v2419_v46, %v2421_v36 }
 0x2cd   : > { %3790 = vmatprep.subr.bf16.mxu0 %v4050_v12  ;;  %v2399_v34 = vsel %vm713_vm0, %v2396_v52, %v2398_v40  ;;  %v2420_v16 = vsel %vm742_vm2, %v2418_v45, %v2419_v46  ;;  %v2502_v43 = vpack.c.bf16 %v4904_v10, %v4932_v1  ;;  %v2397_v51 = vsel %vm713_vm0, %v2395_v38, %v2396_v52 }
 0x2ce   : > { %v2455_v13 = vsel %vm771_vm1, %v2452_v31, %v2454_v41  ;;  %v2504_v4 = vpack.c.bf16 %v2422_v32, %v2420_v16  ;;  %v2453_v37 = vsel %vm771_vm1, %v2451_v47, %v2452_v31  ;;  %v2508_v42 = vpack.c.bf16 %v2399_v34, %v2397_v51 }
 0x2cf   : > { %2874 = vmatmul.mubr.bf16.gmra.mrb[48].mxu0 %v2497_v29  ;;  %2939 = vmatmul.mubr.bf16.gmra.mrb[48].mxu1 %v2499_v19  ;;  %v2510_v49 = vpack.c.bf16 %v2455_v13, %v2453_v37  ;;  %v2426_v57 = vrot.slane %v4951_v21, 2  ;;  %v2467_v50 = vrot.slane %v4906_v44, 4  ;;  %v2423_v59 = vrot.slane %v4958_v30, 2  ;;  %v3100_v29 = vld [vmem:[%s5039_s6] sm:$0xff] }
 0x2d0   : > { %2881 = vmatprep.mubr.bf16.mxu0 %v2503_v58  ;;  %2946 = vmatprep.mubr.bf16.mxu1 %v2505_v33  ;;  %v2424_v60 = vrot.slane %v4896_v55, 2  ;;  %v2464_v56 = vrot.slane %v4889_v27, 4  ;;  %v2465_v35 = vrot.slane %v4876_v6, 4  ;;  %v2507_v44 = vpack.c.bf16 %v4896_v55, %v4958_v30  ;;  %v4055_v27 = vld [vmem:[#allocation3 + $0x3b8] sm:$0xff]  }
 0x2d1   : > { %3791 = vmatpush3.bf16.msra.mxu0 %v4050_v12  ;;  %v2472_v6 = vrot.slane %v4901_v39, 4  ;;  %v2477_v12 = vrot.slane %v4939_v11, 4  ;;  %v2469_v14 = vrot.slane %v4893_v9, 4  ;;  %v2470_v63 = vrot.slane %v4871_v61, 4 }
 0x2d2   : > { %3792 = vmatprep.subr.bf16.mxu0 %v4051_v53  ;;  %v2427_v48 = vsel %vm742_vm2, %v2424_v60, %v2426_v57  ;;  %v2468_v2 = vsel %vm800_vm3, %v2465_v35, %v2467_v50  ;;  %v2425_v3 = vsel %vm742_vm2, %v2423_v59, %v2424_v60  ;;  %v2466_v15 = vsel %vm800_vm3, %v2464_v56, %v2465_v35 }
 0x2d3   : > { %v2509_v8 = vpack.c.bf16 %v2427_v48, %v2425_v3  ;;  %v2496_v7 = vpack.c.bf16 %v2468_v2, %v2466_v15  ;;  %v2474_v17 = vrot.slane %v4932_v1, 4  ;;  %v2475_v18 = vrot.slane %v4904_v10, 4 }
 0x2d4   : > { %v2473_v20 = vsel %vm800_vm3, %v2470_v63, %v2472_v6  ;;  %v2471_v39 = vsel %vm800_vm3, %v2469_v14, %v2470_v63  ;;  %v2482_v9 = vrot.slane %v4951_v21, 4  ;;  %v2479_v61 = vrot.slane %v4958_v30, 4 }
 0x2d5   : > { %3793 = vmatpush3.bf16.msra.mxu0 %v4051_v53  ;;  %v2478_v25 = vsel %vm800_vm3, %v2475_v18, %v2477_v12  ;;  %v2501_v5 = vpack.c.bf16 %v2473_v20, %v2471_v39  ;;  %v2476_v11 = vsel %vm800_vm3, %v2474_v17, %v2475_v18  ;;  %v2480_v1 = vrot.slane %v4896_v55, 4 }
 0x2d6   : > { %3794 = vmatprep.subr.bf16.mxu0 %v4052_v23  ;;  %v2506_v22 = vpack.c.bf16 %v2478_v25, %v2476_v11 }
 0x2d7   : > { %2882 = vmatmul.mubr.bf16.gmra.mrb[52].mxu0 %v2502_v43  ;;  %2947 = vmatmul.mubr.bf16.gmra.mrb[52].mxu1 %v2504_v4  ;;  %v2483_v10 = vsel %vm800_vm3, %v2480_v1, %v2482_v9  ;;  %v2481_v24 = vsel %vm800_vm3, %v2479_v61, %v2480_v1  ;;  %v3435_v9 = vld [vmem:[%s5038_s5 + $0x2] ss:$0 sm:$0xff] }
 0x2d8   : > { %2889 = vmatprep.mubr.bf16.mxu0 %v2508_v42  ;;  %2954 = vmatprep.mubr.bf16.mxu1 %v2510_v49  ;;  %v2511_v0 = vpack.c.bf16 %v2483_v10, %v2481_v24 }
 0x2d9   : > { %3795 = vmatpush3.bf16.msra.mxu0 %v4052_v23 }
 0x2da   : > { %3796 = vmatprep.subr.bf16.mxu0 %v4053_v26 }
 0x2dd   : > { %3797 = vmatpush3.bf16.msra.mxu0 %v4053_v26 }
 0x2de   : > { %3798 = vmatprep.subr.bf16.mxu0 %v4054_v62 }
 0x2df   : > { %2890 = vmatmul.mubr.bf16.gmra.mrb[56].mxu0 %v2507_v44  ;;  %2955 = vmatmul.mubr.bf16.gmra.mrb[56].mxu1 %v2509_v8 }
 0x2e0   : > { %3802 = vmatprep.mubr.bf16.mxu0 %v2496_v7  ;;  %3826 = vmatprep.mubr.msk.f32.mxu1 %vm3104_vm5, %v3100_v29 }
 0x2e1   : > { %3799 = vmatpush3.bf16.msra.mxu0 %v4054_v62 }
 0x2e2   : > { %3800 = vmatprep.subr.bf16.mxu0 %v4055_v27 }
 0x2e5   : > { %3801 = vmatpush3.bf16.msra.mxu0 %v4055_v27 }
 0x2e8   : > { %3803 = vmatmul.mubr.bf16.vlgmr.msra.gmra.mrb[60].mxu0 %v2501_v5 }
 0x2e9   : > { %3806 = vmatprep.mubr.bf16.mxu0 %v2506_v22 }
 0x2f0   : > { %3807 = vmatmul.mubr.bf16.gmra.mrb[64].mxu0 %v2511_v0 }
 0x39a   : > { %v3650_v21 = vpop.f32.mrb[44].mxu0  ;;  %v3690_v19 = vpop.f32.mrb[44].mxu1 }
 0x39b   : > { %v3651_v28 = vpop.f32.mrb[45].mxu0  ;;  %v3691_v54 = vpop.f32.mrb[45].mxu1 }
 0x39c   : > { %v3652_v58 = vadd.f32 %v3651_v28, %v3650_v21  ;;  %v3692_v33 = vadd.f32 %v3691_v54, %v3690_v19  ;;  %v3653_v55 = vpop.f32.mrb[46].mxu0  ;;  %v3693_v53 = vpop.f32.mrb[46].mxu1 }
 0x39d   : > { %v3654_v36 = vpop.f32.mrb[47].mxu0  ;;  %v3694_v30 = vpop.f32.mrb[47].mxu1 }
 0x39e   : > { %v3655_v40 = vadd.f32 %v3654_v36, %v3653_v55  ;;  %v3695_v41 = vadd.f32 %v3694_v30, %v3693_v53  ;;  %v2933_v45 = vadd.f32 %v3692_v33, %v3652_v58 }
 0x3a0   : > { %v2936_v46 = vadd.f32 %v3695_v41, %v3655_v40 }
 0x3a2   : > { %v3656_v38 = vpop.f32.mrb[48].mxu0  ;;  %v3696_v52 = vpop.f32.mrb[48].mxu1 }
 0x3a3   : > { %v3657_v47 = vpop.f32.mrb[49].mxu0  ;;  %v3697_v31 = vpop.f32.mrb[49].mxu1 }
 0x3a4   : > { %v3658_v32 = vadd.f32 %v3657_v47, %v3656_v38  ;;  %v3698_v23 = vadd.f32 %v3697_v31, %v3696_v52  ;;  %v3659_v34 = vpop.f32.mrb[50].mxu0  ;;  %v3699_v13 = vpop.f32.mrb[50].mxu1 }
 0x3a5   : > { %v3660_v16 = vpop.f32.mrb[51].mxu0  ;;  %v3700_v43 = vpop.f32.mrb[51].mxu1 }
 0x3a6   : > { %v3661_v4 = vadd.f32 %v3660_v16, %v3659_v34  ;;  %v3701_v51 = vadd.f32 %v3700_v43, %v3699_v13  ;;  %v2941_v37 = vadd.f32 %v3698_v23, %v3658_v32 }
 0x3a8   : > { %v2944_v42 = vadd.f32 %v3701_v51, %v3661_v4 }
 0x3aa   : > { %v3662_v49 = vpop.f32.mrb[52].mxu0  ;;  %v3702_v26 = vpop.f32.mrb[52].mxu1 }
 0x3ab   : > { %v3663_v57 = vpop.f32.mrb[53].mxu0  ;;  %v3703_v50 = vpop.f32.mrb[53].mxu1 }
 0x3ac   : > { %v3664_v59 = vadd.f32 %v3663_v57, %v3662_v49  ;;  %v3704_v60 = vadd.f32 %v3703_v50, %v3702_v26  ;;  %v3665_v56 = vpop.f32.mrb[54].mxu0  ;;  %v3705_v35 = vpop.f32.mrb[54].mxu1 }
 0x3ad   : > { %v3666_v48 = vpop.f32.mrb[55].mxu0  ;;  %v3706_v62 = vpop.f32.mrb[55].mxu1 }
 0x3ae   : > { %v3667_v2 = vadd.f32 %v3666_v48, %v3665_v56  ;;  %v3707_v3 = vadd.f32 %v3706_v62, %v3705_v35  ;;  %v2949_v44 = vadd.f32 %v3704_v60, %v3664_v59 }
 0x3b0   : > { %v2952_v8 = vadd.f32 %v3707_v3, %v3667_v2 }
 0x3b2   : > { %v3668_v15 = vpop.f32.mrb[56].mxu0  ;;  %v3708_v7 = vpop.f32.mrb[56].mxu1 }
 0x3b3   : > { %v3669_v27 = vpop.f32.mrb[57].mxu0  ;;  %v3709_v6 = vpop.f32.mrb[57].mxu1 }
 0x3b4   : > { %v3670_v12 = vadd.f32 %v3669_v27, %v3668_v15  ;;  %v3710_v14 = vadd.f32 %v3709_v6, %v3708_v7  ;;  %v3671_v63 = vpop.f32.mrb[58].mxu0  ;;  %v3711_v17 = vpop.f32.mrb[58].mxu1 }
 0x3b5   : > { %v3672_v18 = vpop.f32.mrb[59].mxu0  ;;  %v3712_v20 = vpop.f32.mrb[59].mxu1 }
 0x3b6   : > { %v3673_v25 = vadd.f32 %v3672_v18, %v3671_v63  ;;  %v3713_v39 = vadd.f32 %v3712_v20, %v3711_v17  ;;  %v2957_v5 = vadd.f32 %v3710_v14, %v3670_v12 }
 0x3b8   : > { %v2960_v11 = vadd.f32 %v3713_v39, %v3673_v25 }
 0x3bb   : > { %v3804_v22 = vpop.f32.mrb[60].mxu0 }
 0x3bc   : > { %v3006_v61 = vadd.f32 %v3804_v22, %v2941_v37  ;;  %v2997_v1 = vpop.f32.mrb[61].mxu0 }
 0x3bd   : > { %v2998_v10 = vadd.f32 %v2997_v1, %v2933_v45  ;;  %v3805_v24 = vpop.f32.mrb[62].mxu0 }
 0x3be   : > { %v5010_v0 = vadd.f32 %v3435_v9, %v3006_v61  ;;  %v3009_v29 = vadd.f32 %v3805_v24, %v2944_v42  ;;  %v3000_v21 = vpop.f32.mrb[63].mxu0  ;;  %v3101_v24 = vld [vmem:[%s5039_s6 + $0x8] sm:$0xff] }
 0x3bf   : > { %v3036_v19 = vadd.f32 %v3435_v9, %v2998_v10  ;;  %v3001_v28 = vadd.f32 %v3000_v21, %v2936_v46 }
 0x3c0   : > { %v3438_v54 = vmul.f32 -1.442695, %v5010_v0  ;;  %v3039_v58 = vadd.f32 %v3435_v9, %v3009_v29  ;;  %v3103_v29 = vld [vmem:[%s5039_s6 + $0x18] sm:$0xff] }
 0x3c1   : > { %v3436_v33 = vmul.f32 -1.442695, %v3036_v19  ;;  %v3037_v55 = vadd.f32 %v3435_v9, %v3001_v28 }
 0x3c2   : > { %4120 = vpow2.f32 %v3438_v54  ;;  %v3439_v53 = vmul.f32 -1.442695, %v3039_v58 }
 0x3c3   : > { %4122 = vpow2.f32 %v3436_v33  ;;  %v3437_v36 = vmul.f32 -1.442695, %v3037_v55  ;;  %v3808_v30 = vpop.f32.mrb[64].mxu0 }
 0x3c4   : > { %4124 = vpow2.f32 %v3439_v53  ;;  %v3022_v40 = vadd.f32 %v3808_v30, %v2957_v5  ;;  %v3013_v41 = vpop.f32.mrb[65].mxu0 }
 0x3c5   : > { %4126 = vpow2.f32 %v3437_v36  ;;  %v3014_v45 = vadd.f32 %v3013_v41, %v2949_v44  ;;  %v3809_v38 = vpop.f32.mrb[66].mxu0 }
 0x3c6   : > { %v3042_v52 = vadd.f32 %v3435_v9, %v3022_v40  ;;  %v3025_v47 = vadd.f32 %v3809_v38, %v2960_v11  ;;  %v3016_v31 = vpop.f32.mrb[67].mxu0 }
 0x3c7   : > { %v3040_v46 = vadd.f32 %v3435_v9, %v3014_v45  ;;  %v3017_v32 = vadd.f32 %v3016_v31, %v2952_v8 }
 0x3c8   : > { %v3442_v23 = vmul.f32 -1.442695, %v3042_v52  ;;  %v3043_v34 = vadd.f32 %v3435_v9, %v3025_v47 }
 0x3c9   : > { %v3440_v13 = vmul.f32 -1.442695, %v3040_v46  ;;  %v3041_v16 = vadd.f32 %v3435_v9, %v3017_v32 }
 0x3ca   : > { %4128 = vpow2.f32 %v3442_v23  ;;  %v3443_v43 = vmul.f32 -1.442695, %v3043_v34 }
 0x3cb   : > { %4130 = vpow2.f32 %v3440_v13  ;;  %v3441_v4 = vmul.f32 -1.442695, %v3041_v16 }
 0x3cc   : > { %v4121_v51 = vpop.eup %4120  ;;  %4132 = vpow2.f32 %v3443_v43 }
 0x3cd   : > { %v4123_v37 = vpop.eup %4122  ;;  %v3070_v42 = vadd.f32 1.0, %v4121_v51  ;;  %4134 = vpow2.f32 %v3441_v4 }
 0x3ce   : > { %v4125_v49 = vpop.eup %4124  ;;  %v3068_v26 = vadd.f32 1.0, %v4123_v37 }
 0x3cf   : > { %v4127_v57 = vpop.eup %4126  ;;  %4136 = vrcp.f32 %v3070_v42  ;;  %v3071_v50 = vadd.f32 1.0, %v4125_v49 }
 0x3d0   : > { %4138 = vrcp.f32 %v3068_v26  ;;  %v3069_v59 = vadd.f32 1.0, %v4127_v57 }
 0x3d1   : > { %4140 = vrcp.f32 %v3071_v50 }
 0x3d2   : > { %4142 = vrcp.f32 %v3069_v59 }
 0x3d4   : > { %v4129_v60 = vpop.eup %4128 }
 0x3d5   : > { %v4131_v56 = vpop.eup %4130  ;;  %v3074_v35 = vadd.f32 1.0, %v4129_v60 }
 0x3d6   : > { %v4133_v48 = vpop.eup %4132  ;;  %v3072_v62 = vadd.f32 1.0, %v4131_v56 }
 0x3d7   : > { %v4135_v2 = vpop.eup %4134  ;;  %4144 = vrcp.f32 %v3074_v35  ;;  %v3075_v3 = vadd.f32 1.0, %v4133_v48 }
 0x3d8   : > { %4146 = vrcp.f32 %v3072_v62  ;;  %v3073_v44 = vadd.f32 1.0, %v4135_v2 }
 0x3d9   : > { %v4137_v8 = vpop.eup %4136  ;;  %4148 = vrcp.f32 %v3075_v3 }
 0x3da   : > { %v4139_v15 = vpop.eup %4138  ;;  %4150 = vrcp.f32 %v3073_v44  ;;  %v3094_v6 = vmul.f32 %v4137_v8, %v5010_v0  ;;  %v3102_v0 = vld [vmem:[%s5039_s6 + $0x10] sm:$0xff] }
 0x3db   : > { %v4141_v7 = vpop.eup %4140  ;;  %v3092_v14 = vmul.f32 %v4139_v15, %v3036_v19 }
 0x3dc   : > { %v4143_v27 = vpop.eup %4142  ;;  %v3095_v12 = vmul.f32 %v4141_v7, %v3039_v58 }
 0x3dd   : > { %v3093_v63 = vmul.f32 %v4143_v27, %v3037_v55 }
 0x3de   : > { %v3900_v17 = vpack.c.bf16 %v3095_v12, %v3094_v6 }
 0x3df   : > { %v3896_v18 = vpack.c.bf16 %v3093_v63, %v3092_v14 }
 0x3e1   : > { %v4145_v20 = vpop.eup %4144  ;;  %3897 = vmatprep.subr.bf16.mxu1 %v3896_v18 }
 0x3e2   : > { %v4147_v25 = vpop.eup %4146  ;;  %3899 = vmatpush3.bf16.msra.mxu1 %v3896_v18  ;;  %v3098_v11 = vmul.f32 %v4145_v20, %v3042_v52 }
 0x3e3   : > { %v4149_v39 = vpop.eup %4148  ;;  %3901 = vmatprep.subr.bf16.mxu1 %v3900_v17  ;;  %v3096_v9 = vmul.f32 %v4147_v25, %v3040_v46 }
 0x3e4   : > { %v4151_v5 = vpop.eup %4150  ;;  %v3099_v22 = vmul.f32 %v4149_v39, %v3043_v34 }
 0x3e5   : > { %v3097_v61 = vmul.f32 %v4151_v5, %v3041_v16 }
 0x3e6   : > { %3903 = vmatpush3.bf16.msra.mxu1 %v3900_v17  ;;  %v3908_v1 = vpack.c.bf16 %v3099_v22, %v3098_v11 }
 0x3e7   : > { %v3904_v10 = vpack.c.bf16 %v3097_v61, %v3096_v9 }
 0x3e9   : > { %3905 = vmatprep.subr.bf16.mxu1 %v3904_v10 }
 0x3ea   : > { %3907 = vmatpush3.bf16.msra.mxu1 %v3904_v10 }
 0x3eb   : > { %3909 = vmatprep.subr.bf16.mxu1 %v3908_v1 }
 0x3ee   : > { %3911 = vmatpush3.bf16.msra.mxu1 %v3908_v1 }
 0x3f1   : > { %3827 = vmatmul.mubr.msk.f32.vlgmr.msra.gmra.mrb[2].mxu1 %vm3104_vm5, %v3101_v24 }
 0x3f2   : > { %3829 = vmatprep.mubr.msk.f32.mxu1 %vm3104_vm5, %v3102_v0 }
 0x3f5   : > { %3830 = vmatmul.mubr.msk.f32.gmra.mrb[60].mxu1 %vm3104_vm5, %v3103_v29 }
 0x4c4   : > { %v3828_v21 = vpop.f32.mrb[2].mxu1 }
 0x4c5   : > { %v3183_v19 = vpop.f32.mrb[3].mxu1  ;;  %3203 = vst [vmem:[%s317_s30 + $0x8] sm:$0xff] %v3828_v21 }
 0x4c6   : > { %3202 = vst [vmem:[%s317_s30] sm:$0xff] %v3183_v19 }
 0x4c8   : > { %v3831_v28 = vpop.f32.mrb[60].mxu1 }
 0x4c9   : > { %v3193_v54 = vpop.f32.mrb[61].mxu1  ;;  %3205 = vst [vmem:[%s317_s30 + $0x18] sm:$0xff] %v3831_v28 }
 0x4ca   : > { %3204 = vst [vmem:[%s317_s30 + $0x10] sm:$0xff] %v3193_v54 }
 0x4cb PF: > { %s18_s24 = sadd.s32 1, %s4202_s24  }
 0x4cc   : > { %p15_p3 = scmp.ge.s32.totalorder %s18_s24, 4  }
 0x4ce   :  { %17 = sbr.rel (!%p15_p3) target bundleno = 1 (0x1), region = 90 }
 0x4d5   :  { %3228 = vsyncpa [#allocation4], 1 }
 0x4d6   :  { %3230 = vsyncpa [#allocation4 + $0x1], 1 }

</bundles_post_ra>
